<compile_context>
chip_gen: v5e
topology: v5e:2x2
jax: 0.10.0
libtpu: 0.0.40
codegen_flags: <defaults>
</compile_context>

<pallas_src>
import numpy as np
import jax
import jax.numpy as jnp
from jax import lax
from jax.experimental import pallas as pl
from jax.experimental.pallas import tpu as pltpu

DIM = 32            # protein_emb_dim == GNN dim
N_FINGERPRINTS = 50
PROT_VOCAB = 26     # nn.Embedding(26, dim, padding_idx=0)
KSIZE = 5
LAYER_HIDDEN = 3
N_CONV = 3
BN_EPS = 1e-5


def _round_up(x, m):
    return (x + m - 1) // m * m


# ---------------------------------------------------------------------------
# Single fused Pallas kernel (drug GNN + protein CNN, two outputs)
# ---------------------------------------------------------------------------
def _make_dp_fused_kernel(n_batch, l0, l3):
    """Factory closing over the static protein-batch geometry."""

    def kernel(x_ref, a_ref, seg_ref, gw_ref, gb_ref,
               p_ref, cw_ref, cb_ref, scale_ref, shift_ref,
               d_out_ref, p_out_ref):
        # ---------------- Drug GNN: 3 layers + per-molecule sum pooling ------
        # TODO(synk): update rule h = relu(Wx+b); hs = h + A@h; L2-normalize
        # follows the Tsubaki-style MolecularGraphNeuralNetwork; re-verify
        # against the exact PyTorch source if it differs.
        x = x_ref[...]                                    # (Np, D) bf16
        a = a_ref[...]                                    # (Np, Np) bf16
        for l in range(LAYER_HIDDEN):                     # static unroll; VMEM-resident
            h = jnp.dot(x, gw_ref[l], preferred_element_type=jnp.float32) + gb_ref[l]
            h = jnp.maximum(h, 0.0)                       # relu(Linear(x)), f32 (VPU)
            hs = h + jnp.dot(a, h.astype(jnp.bfloat16),
                             preferred_element_type=jnp.float32)
            ssq = jnp.sum(hs * hs, axis=1, keepdims=True)
            # F.normalize(hs, 2, 1) with eps=1e-12; rsqrt lands on the EUP slot.
            x = (hs * lax.rsqrt(jnp.maximum(ssq, 1e-24))).astype(jnp.bfloat16)
        # Per-molecule sum of node vectors as one indicator matmul.
        d_out_ref[...] = jnp.dot(seg_ref[...], x, preferred_element_type=jnp.float32)

        # -------- Protein CNN: 3 x (valid Conv1d + ReLU + eval BatchNorm1d) --
        # Whole batch as one flat (B*L0, C) slab; each stage is K accumulated
        # 32x32 tap matmuls over sublane-shifted slices (no lane-concat im2col,
        # no per-batch loop).  Windows spanning batch boundaries are garbage
        # rows that later valid windows never read; they are dropped at store.
        x16 = p_ref[...]                                  # (B*L0, C) bf16
        xf = None
        for s in range(N_CONV):                           # static unroll
            rows = x16.shape[0] - (KSIZE - 1)
            acc = jnp.dot(x16[0:rows, :], cw_ref[s * KSIZE + 0],
                          preferred_element_type=jnp.float32)
            for k in range(1, KSIZE):
                acc = acc + jnp.dot(x16[k:k + rows, :], cw_ref[s * KSIZE + k],
                                    preferred_element_type=jnp.float32)
            acc = jnp.maximum(acc + cb_ref[s], 0.0)        # conv bias + ReLU (f32, VPU)
            xf = acc * scale_ref[s] + shift_ref[s]         # BatchNorm1d eval (f32, VPU)
            x16 = xf.astype(jnp.bfloat16)                  # bf16 only for next MXU stage
        # One contiguous (B*L3, C) store (no per-row masked vst).
        p_out_ref[...] = jnp.concatenate(
            [xf[b * l0:b * l0 + l3, :] for b in range(n_batch)], axis=0)

    return kernel


def dp_fused_forward(x_nodes, adj, seg, gw_stack, gb_stack,
                     p_flat, cw_stack, cb_stack, scale_stack, shift_stack,
                     n_batch, l0, l3):
    n_pad, d = x_nodes.shape
    m_pad = seg.shape[0]
    bl0, c = p_flat.shape
    kernel = _make_dp_fused_kernel(n_batch, l0, l3)
    # TODO(synk): for large graphs (N >~ 2k nodes) tile the (N, N) adjacency over
    # a trailing "arbitrary" reduction axis with a VMEM accumulator (or go
    # block-diagonal per molecule via scalar prefetch) and single-buffer the
    # full-array specs; untiled + double-buffered it would blow scoped VMEM,
    # especially on v7x's 64 MiB.  Fine at these sizes.
    return pl.pallas_call(
        kernel,
        out_shape=(jax.ShapeDtypeStruct((m_pad, d), jnp.float32),
                   jax.ShapeDtypeStruct((n_batch * l3, c), jnp.float32)),
        grid=(1,),
        in_specs=[
            pl.BlockSpec((n_pad, d), lambda i: (0, 0)),
            pl.BlockSpec((n_pad, n_pad), lambda i: (0, 0)),
            pl.BlockSpec((m_pad, n_pad), lambda i: (0, 0)),
            pl.BlockSpec((LAYER_HIDDEN, d, d), lambda i: (0, 0, 0)),
            pl.BlockSpec((LAYER_HIDDEN, 1, d), lambda i: (0, 0, 0)),
            pl.BlockSpec((bl0, c), lambda i: (0, 0)),
            pl.BlockSpec((N_CONV * KSIZE, c, c), lambda i: (0, 0, 0)),
            pl.BlockSpec((N_CONV, 1, c), lambda i: (0, 0, 0)),
            pl.BlockSpec((N_CONV, 1, c), lambda i: (0, 0, 0)),
            pl.BlockSpec((N_CONV, 1, c), lambda i: (0, 0, 0)),
        ],
        out_specs=(pl.BlockSpec((m_pad, d), lambda i: (0, 0)),
                   pl.BlockSpec((n_batch * l3, c), lambda i: (0, 0))),
        compiler_params=pltpu.CompilerParams(dimension_semantics=("arbitrary",)),
    )(x_nodes, adj, seg, gw_stack, gb_stack,
      p_flat, cw_stack, cb_stack, scale_stack, shift_stack)


# ---------------------------------------------------------------------------
# Module-level forward (glue: parameter handling, padding, embeddings)
# ---------------------------------------------------------------------------
def init_params(key):
    ks = jax.random.split(key, 26)
    params = {}
    # MolecularGraphNeuralNetwork: Embedding(N_fingerprints, dim) + 3 x Linear(dim, dim)
    params["fp_emb"] = jax.random.normal(ks[0], (N_FINGERPRINTS, DIM), jnp.float32)
    params["gnn_w"] = [0.1 * jax.random.normal(ks[1 + l], (DIM, DIM), jnp.float32)
                       for l in range(LAYER_HIDDEN)]               # stored as (in, out) = W.T
    params["gnn_b"] = [0.05 * jax.random.normal(ks[4 + l], (1, DIM), jnp.float32)
                       for l in range(LAYER_HIDDEN)]
    # TODO(synk): layer_output=3 output-MLP weights exist in __init__ but are unused in forward.

    # ProteinCNN: Embedding(26, dim, padding_idx=0) + 3 x (Conv1d(k=5) + BatchNorm1d)
    prot_emb = jax.random.normal(ks[7], (PROT_VOCAB, DIM), jnp.float32)
    params["prot_emb"] = prot_emb.at[0].set(0.0)                     # padding_idx=0
    params["conv_w"] = [0.1 * jax.random.normal(ks[8 + i], (KSIZE, DIM, DIM), jnp.float32)
                        for i in range(N_CONV)]                      # (K, C_in, C_out)
    params["conv_b"] = [0.05 * jax.random.normal(ks[11 + i], (1, DIM), jnp.float32)
                        for i in range(N_CONV)]
    params["bn_gamma"] = [1.0 + 0.1 * jax.random.normal(ks[14 + i], (DIM,), jnp.float32)
                          for i in range(N_CONV)]
    params["bn_beta"] = [0.1 * jax.random.normal(ks[17 + i], (DIM,), jnp.float32)
                         for i in range(N_CONV)]
    params["bn_mean"] = [0.05 * jax.random.normal(ks[20 + i], (DIM,), jnp.float32)
                         for i in range(N_CONV)]
    params["bn_var"] = [1.0 + 0.1 * jnp.abs(jax.random.normal(ks[23 + i], (DIM,), jnp.float32))
                        for i in range(N_CONV)]
    return params


def dp_raw_feature_forward(v_d_samples, v_p, params, emb_init=None):
    v_d = tuple(zip(*v_d_samples))        # list(zip(*v_d[:]))
    fingerprints_list, adjacencies_list, molecular_sizes = v_d

    # -------------------- Drug side: host-side batch assembly -----------------
    fingerprints = np.concatenate([np.asarray(f, np.int32) for f in fingerprints_list])
    n_total = int(fingerprints.shape[0])
    n_mol = len(molecular_sizes)
    n_pad = _round_up(max(n_total, 8), 8)     # sublane-align node count
    m_pad = _round_up(max(n_mol, 8), 8)       # sublane-align molecule count

    # Block-diagonal adjacency + molecule-membership indicator (numpy, once per batch).
    # TODO(synk): for production, precompute/reuse these device buffers across calls.
    adj = np.zeros((n_pad, n_pad), np.float32)
    seg = np.zeros((m_pad, n_pad), np.float32)
    off = 0
    for m, (a, sz) in enumerate(zip(adjacencies_list, molecular_sizes)):
        sz = int(sz)
        adj[off:off + sz, off:off + sz] = np.asarray(a, np.float32)
        seg[m, off:off + sz] = 1.0
        off += sz

    # Fingerprint embedding (gather done in glue), zero-padded to n_pad rows.
    if emb_init is None:
        x = jnp.take(params["fp_emb"], jnp.asarray(fingerprints, jnp.int32), axis=0)
    else:
        x = jnp.asarray(emb_init, jnp.float32)
    x = jnp.zeros((n_pad, DIM), jnp.float32).at[:n_total].set(x)

    gw_stack = jnp.stack(params["gnn_w"]).astype(jnp.bfloat16)     # (3, D, D)
    gb_stack = jnp.stack(params["gnn_b"])                           # (3, 1, D) f32

    # -------------------- Protein side: embedding + param stacks --------------
    v_p = jnp.asarray(v_p, jnp.int32)
    bsz, l0 = v_p.shape
    l3 = l0 - N_CONV * (KSIZE - 1)
    p = jnp.take(params["prot_emb"], v_p, axis=0)                   # (B, L0, C)
    p_flat = p.reshape(bsz * l0, DIM).astype(jnp.bfloat16)          # flat channels-last slab

    cw_stack = (jnp.stack(params["conv_w"])                          # (3, K, C, C)
                .reshape(N_CONV * KSIZE, DIM, DIM).astype(jnp.bfloat16))
    cb_stack = jnp.stack(params["conv_b"])                           # (3, 1, C) f32
    scales, shifts = [], []
    for i in range(N_CONV):
        scale = params["bn_gamma"][i] / jnp.sqrt(params["bn_var"][i] + BN_EPS)
        shift = params["bn_beta"][i] - params["bn_mean"][i] * scale
        scales.append(scale.reshape(1, DIM))
        shifts.append(shift.reshape(1, DIM))
    scale_stack = jnp.stack(scales)                                  # (3, 1, C)
    shift_stack = jnp.stack(shifts)                                  # (3, 1, C)

    # -------------------- ONE fused kernel launch ----------------------------
    d_out, p_out = dp_fused_forward(
        x.astype(jnp.bfloat16),
        jnp.asarray(adj, jnp.bfloat16),     # 0/1 indicator, exact in bf16
        jnp.asarray(seg, jnp.bfloat16),
        gw_stack, gb_stack,
        p_flat, cw_stack, cb_stack, scale_stack, shift_stack,
        bsz, l0, l3)

    trans_d = d_out[:n_mol]                                          # (n_mol, DIM)

    # PyTorch: v has shape (B, C, L3) and does v.view(B, L3, C)  (a memory
    # reinterpret, NOT a transpose).  Reproduce exactly from our (B, L3, C).
    x_p = p_out.reshape(bsz, l3, DIM)                                # (B, L3, C)
    v_bcl = jnp.transpose(x_p, (0, 2, 1))                            # (B, C, L3)
    trans_p = v_bcl.reshape(bsz, l3, DIM)
    return trans_d, trans_p


# ---------------------------------------------------------------------------
if __name__ == "__main__":
    key = jax.random.PRNGKey(0)
    k_par, k_fp1, k_fp2, k_a1, k_a2, k_prot = jax.random.split(key, 6)

    params = init_params(k_par)

    # Drug batch: 2 molecules with 5 and 3 atoms.
    def rand_adj(k, n):
        a = (jax.random.uniform(k, (n, n)) > 0.5).astype(jnp.float32)
        a = jnp.triu(a, 1)
        return a + a.T                                               # symmetric, no self loops

    sizes = [5, 3]
    fp1 = jax.random.randint(k_fp1, (sizes[0],), 0, N_FINGERPRINTS, jnp.int32)
    fp2 = jax.random.randint(k_fp2, (sizes[1],), 0, N_FINGERPRINTS, jnp.int32)
    v_d_samples = [(fp1, rand_adj(k_a1, sizes[0]), sizes[0]),
                   (fp2, rand_adj(k_a2, sizes[1]), sizes[1])]

    # Protein batch: (B=2, L=23) integer sequences, vocab 26 (0 = padding).
    v_p = jax.random.randint(k_prot, (2, 23), 0, PROT_VOCAB, jnp.int32)

    trans_d, trans_p = dp_raw_feature_forward(v_d_samples, v_p, params)
    jax.block_until_ready((trans_d, trans_p))

    assert trans_d.shape == (2, DIM)                                  # one vector per molecule
    assert trans_p.shape == (2, 23 - 3 * (KSIZE - 1), DIM)            # (B, L-12, dim)
    print("KERNEL_OK")
</pallas_src>

<mosaic_0001>
module attributes {stable_mosaic.version = 11 : i64} {
  func.func @kernel(%arg0: i32, %arg1: memref<8x32xbf16, #tpu.memory_space<vmem>>, %arg2: memref<8x8xbf16, #tpu.memory_space<vmem>>, %arg3: memref<8x8xbf16, #tpu.memory_space<vmem>>, %arg4: memref<3x32x32xbf16, #tpu.memory_space<vmem>>, %arg5: memref<3x1x32xf32, #tpu.memory_space<vmem>>, %arg6: memref<46x32xbf16, #tpu.memory_space<vmem>>, %arg7: memref<15x32x32xbf16, #tpu.memory_space<vmem>>, %arg8: memref<3x1x32xf32, #tpu.memory_space<vmem>>, %arg9: memref<3x1x32xf32, #tpu.memory_space<vmem>>, %arg10: memref<3x1x32xf32, #tpu.memory_space<vmem>>, %arg11: memref<8x32xf32, #tpu.memory_space<vmem>>, %arg12: memref<22x32xf32, #tpu.memory_space<vmem>>) attributes {dimension_semantics = [#tpu.dimension_semantics<arbitrary>], iteration_bounds = array<i64: 1>, scalar_prefetch = 0 : i64, scratch_operands = 0 : i64, tpu.core_type = #tpu.core_type<tc>, window_params = [{pipeline_mode = #tpu.pipeline_mode<synchronous>, transform_indices = @transform_0, window_bounds = array<i64: 8, 32>}, {pipeline_mode = #tpu.pipeline_mode<synchronous>, transform_indices = @transform_1, window_bounds = array<i64: 8, 8>}, {pipeline_mode = #tpu.pipeline_mode<synchronous>, transform_indices = @transform_2, window_bounds = array<i64: 8, 8>}, {pipeline_mode = #tpu.pipeline_mode<synchronous>, transform_indices = @transform_3, window_bounds = array<i64: 3, 32, 32>}, {pipeline_mode = #tpu.pipeline_mode<synchronous>, transform_indices = @transform_4, window_bounds = array<i64: 3, 1, 32>}, {pipeline_mode = #tpu.pipeline_mode<synchronous>, transform_indices = @transform_5, window_bounds = array<i64: 46, 32>}, {pipeline_mode = #tpu.pipeline_mode<synchronous>, transform_indices = @transform_6, window_bounds = array<i64: 15, 32, 32>}, {pipeline_mode = #tpu.pipeline_mode<synchronous>, transform_indices = @transform_7, window_bounds = array<i64: 3, 1, 32>}, {pipeline_mode = #tpu.pipeline_mode<synchronous>, transform_indices = @transform_8, window_bounds = array<i64: 3, 1, 32>}, {pipeline_mode = #tpu.pipeline_mode<synchronous>, transform_indices = @transform_9, window_bounds = array<i64: 3, 1, 32>}, {pipeline_mode = #tpu.pipeline_mode<synchronous>, transform_indices = @transform_10, window_bounds = array<i64: 8, 32>}, {pipeline_mode = #tpu.pipeline_mode<synchronous>, transform_indices = @transform_11, window_bounds = array<i64: 22, 32>}]} {
    %c0 = arith.constant 0 : index
    %c0_0 = arith.constant 0 : index
    %0 = vector.load %arg1[%c0, %c0_0] : memref<8x32xbf16, #tpu.memory_space<vmem>>, vector<8x32xbf16>
    %c0_1 = arith.constant 0 : index
    %c0_2 = arith.constant 0 : index
    %1 = vector.load %arg2[%c0_1, %c0_2] : memref<8x8xbf16, #tpu.memory_space<vmem>>, vector<8x8xbf16>
    %c0_3 = arith.constant 0 : index
    %c0_4 = arith.constant 0 : index
    %c0_5 = arith.constant 0 : index
    %2 = vector.load %arg4[%c0_3, %c0_4, %c0_5] : memref<3x32x32xbf16, #tpu.memory_space<vmem>>, vector<1x32x32xbf16>
    %3 = vector.shape_cast %2 : vector<1x32x32xbf16> to vector<32x32xbf16>
    %cst = arith.constant dense<0.000000e+00> : vector<8x32xf32>
    %4 = tpu.matmul %0, %3, %cst {dimension_numbers = #tpu.dot_dimension_numbers<[1], [0], [0], [1], [0, 0, 1, 1], [], []>} : vector<8x32xbf16>, vector<32x32xbf16>, vector<8x32xf32> -> vector<8x32xf32>
    %c0_6 = arith.constant 0 : index
    %c0_7 = arith.constant 0 : index
    %c0_8 = arith.constant 0 : index
    %5 = vector.load %arg5[%c0_6, %c0_7, %c0_8] : memref<3x1x32xf32, #tpu.memory_space<vmem>>, vector<1x1x32xf32>
    %6 = vector.shape_cast %5 : vector<1x1x32xf32> to vector<1x32xf32>
    %7 = vector.broadcast %6 : vector<1x32xf32> to vector<8x32xf32>
    %8 = arith.addf %4, %7 : vector<8x32xf32>
    %cst_9 = arith.constant 0.000000e+00 : f32
    %9 = vector.broadcast %cst_9 : f32 to vector<8x32xf32>
    %10 = arith.maximumf %8, %9 : vector<8x32xf32>
    %11 = arith.truncf %10 : vector<8x32xf32> to vector<8x32xbf16>
    %cst_10 = arith.constant dense<0.000000e+00> : vector<8x32xf32>
    %12 = tpu.matmul %1, %11, %cst_10 {dimension_numbers = #tpu.dot_dimension_numbers<[1], [0], [0], [1], [0, 0, 1, 1], [], []>} : vector<8x8xbf16>, vector<8x32xbf16>, vector<8x32xf32> -> vector<8x32xf32>
    %13 = arith.addf %10, %12 : vector<8x32xf32>
    %14 = arith.mulf %13, %13 : vector<8x32xf32>
    %cst_11 = arith.constant dense<0.000000e+00> : vector<8xf32>
    %15 = vector.multi_reduction <add>, %14, %cst_11 [1] : vector<8x32xf32> to vector<8xf32>
    %16 = vector.shape_cast %15 : vector<8xf32> to vector<8x1xf32>
    %cst_12 = arith.constant 1.000000e-24 : f32
    %17 = vector.broadcast %cst_12 : f32 to vector<8x1xf32>
    %18 = arith.maximumf %16, %17 : vector<8x1xf32>
    %19 = math.rsqrt %18 : vector<8x1xf32>
    %20 = vector.broadcast %19 : vector<8x1xf32> to vector<8x32xf32>
    %21 = arith.mulf %13, %20 : vector<8x32xf32>
    %22 = arith.truncf %21 : vector<8x32xf32> to vector<8x32xbf16>
    %c1 = arith.constant 1 : index
    %c0_13 = arith.constant 0 : index
    %c0_14 = arith.constant 0 : index
    %23 = vector.load %arg4[%c1, %c0_13, %c0_14] : memref<3x32x32xbf16, #tpu.memory_space<vmem>>, vector<1x32x32xbf16>
    %24 = vector.shape_cast %23 : vector<1x32x32xbf16> to vector<32x32xbf16>
    %cst_15 = arith.constant dense<0.000000e+00> : vector<8x32xf32>
    %25 = tpu.matmul %22, %24, %cst_15 {dimension_numbers = #tpu.dot_dimension_numbers<[1], [0], [0], [1], [0, 0, 1, 1], [], []>} : vector<8x32xbf16>, vector<32x32xbf16>, vector<8x32xf32> -> vector<8x32xf32>
    %c1_16 = arith.constant 1 : index
    %c0_17 = arith.constant 0 : index
    %c0_18 = arith.constant 0 : index
    %26 = vector.load %arg5[%c1_16, %c0_17, %c0_18] : memref<3x1x32xf32, #tpu.memory_space<vmem>>, vector<1x1x32xf32>
    %27 = vector.shape_cast %26 : vector<1x1x32xf32> to vector<1x32xf32>
    %28 = vector.broadcast %27 : vector<1x32xf32> to vector<8x32xf32>
    %29 = arith.addf %25, %28 : vector<8x32xf32>
    %cst_19 = arith.constant 0.000000e+00 : f32
    %30 = vector.broadcast %cst_19 : f32 to vector<8x32xf32>
    %31 = arith.maximumf %29, %30 : vector<8x32xf32>
    %32 = arith.truncf %31 : vector<8x32xf32> to vector<8x32xbf16>
    %cst_20 = arith.constant dense<0.000000e+00> : vector<8x32xf32>
    %33 = tpu.matmul %1, %32, %cst_20 {dimension_numbers = #tpu.dot_dimension_numbers<[1], [0], [0], [1], [0, 0, 1, 1], [], []>} : vector<8x8xbf16>, vector<8x32xbf16>, vector<8x32xf32> -> vector<8x32xf32>
    %34 = arith.addf %31, %33 : vector<8x32xf32>
    %35 = arith.mulf %34, %34 : vector<8x32xf32>
    %cst_21 = arith.constant dense<0.000000e+00> : vector<8xf32>
    %36 = vector.multi_reduction <add>, %35, %cst_21 [1] : vector<8x32xf32> to vector<8xf32>
    %37 = vector.shape_cast %36 : vector<8xf32> to vector<8x1xf32>
    %cst_22 = arith.constant 1.000000e-24 : f32
    %38 = vector.broadcast %cst_22 : f32 to vector<8x1xf32>
    %39 = arith.maximumf %37, %38 : vector<8x1xf32>
    %40 = math.rsqrt %39 : vector<8x1xf32>
    %41 = vector.broadcast %40 : vector<8x1xf32> to vector<8x32xf32>
    %42 = arith.mulf %34, %41 : vector<8x32xf32>
    %43 = arith.truncf %42 : vector<8x32xf32> to vector<8x32xbf16>
    %c2 = arith.constant 2 : index
    %c0_23 = arith.constant 0 : index
    %c0_24 = arith.constant 0 : index
    %44 = vector.load %arg4[%c2, %c0_23, %c0_24] : memref<3x32x32xbf16, #tpu.memory_space<vmem>>, vector<1x32x32xbf16>
    %45 = vector.shape_cast %44 : vector<1x32x32xbf16> to vector<32x32xbf16>
    %cst_25 = arith.constant dense<0.000000e+00> : vector<8x32xf32>
    %46 = tpu.matmul %43, %45, %cst_25 {dimension_numbers = #tpu.dot_dimension_numbers<[1], [0], [0], [1], [0, 0, 1, 1], [], []>} : vector<8x32xbf16>, vector<32x32xbf16>, vector<8x32xf32> -> vector<8x32xf32>
    %c2_26 = arith.constant 2 : index
    %c0_27 = arith.constant 0 : index
    %c0_28 = arith.constant 0 : index
    %47 = vector.load %arg5[%c2_26, %c0_27, %c0_28] : memref<3x1x32xf32, #tpu.memory_space<vmem>>, vector<1x1x32xf32>
    %48 = vector.shape_cast %47 : vector<1x1x32xf32> to vector<1x32xf32>
    %49 = vector.broadcast %48 : vector<1x32xf32> to vector<8x32xf32>
    %50 = arith.addf %46, %49 : vector<8x32xf32>
    %cst_29 = arith.constant 0.000000e+00 : f32
    %51 = vector.broadcast %cst_29 : f32 to vector<8x32xf32>
    %52 = arith.maximumf %50, %51 : vector<8x32xf32>
    %53 = arith.truncf %52 : vector<8x32xf32> to vector<8x32xbf16>
    %cst_30 = arith.constant dense<0.000000e+00> : vector<8x32xf32>
    %54 = tpu.matmul %1, %53, %cst_30 {dimension_numbers = #tpu.dot_dimension_numbers<[1], [0], [0], [1], [0, 0, 1, 1], [], []>} : vector<8x8xbf16>, vector<8x32xbf16>, vector<8x32xf32> -> vector<8x32xf32>
    %55 = arith.addf %52, %54 : vector<8x32xf32>
    %56 = arith.mulf %55, %55 : vector<8x32xf32>
    %cst_31 = arith.constant dense<0.000000e+00> : vector<8xf32>
    %57 = vector.multi_reduction <add>, %56, %cst_31 [1] : vector<8x32xf32> to vector<8xf32>
    %58 = vector.shape_cast %57 : vector<8xf32> to vector<8x1xf32>
    %cst_32 = arith.constant 1.000000e-24 : f32
    %59 = vector.broadcast %cst_32 : f32 to vector<8x1xf32>
    %60 = arith.maximumf %58, %59 : vector<8x1xf32>
    %61 = math.rsqrt %60 : vector<8x1xf32>
    %62 = vector.broadcast %61 : vector<8x1xf32> to vector<8x32xf32>
    %63 = arith.mulf %55, %62 : vector<8x32xf32>
    %64 = arith.truncf %63 : vector<8x32xf32> to vector<8x32xbf16>
    %c0_33 = arith.constant 0 : index
    %c0_34 = arith.constant 0 : index
    %65 = vector.load %arg3[%c0_33, %c0_34] : memref<8x8xbf16, #tpu.memory_space<vmem>>, vector<8x8xbf16>
    %cst_35 = arith.constant dense<0.000000e+00> : vector<8x32xf32>
    %66 = tpu.matmul %65, %64, %cst_35 {dimension_numbers = #tpu.dot_dimension_numbers<[1], [0], [0], [1], [0, 0, 1, 1], [], []>} : vector<8x8xbf16>, vector<8x32xbf16>, vector<8x32xf32> -> vector<8x32xf32>
    %c0_36 = arith.constant 0 : index
    %c0_37 = arith.constant 0 : index
    %67 = vector.load %arg11[%c0_36, %c0_37] : memref<8x32xf32, #tpu.memory_space<vmem>>, vector<8x32xf32>
    tpu.vector_store %arg11[%c0_36, %c0_37], %66 {strides = array<i32>} : memref<8x32xf32, #tpu.memory_space<vmem>>, vector<8x32xf32>,
    %c0_38 = arith.constant 0 : index
    %c0_39 = arith.constant 0 : index
    %68 = vector.load %arg6[%c0_38, %c0_39] : memref<46x32xbf16, #tpu.memory_space<vmem>>, vector<46x32xbf16>
    %69 = vector.extract_strided_slice %68 {offsets = [0, 0], sizes = [42, 32], strides = [1, 1]} : vector<46x32xbf16> to vector<42x32xbf16>
    %c0_40 = arith.constant 0 : index
    %c0_41 = arith.constant 0 : index
    %c0_42 = arith.constant 0 : index
    %70 = vector.load %arg7[%c0_40, %c0_41, %c0_42] : memref<15x32x32xbf16, #tpu.memory_space<vmem>>, vector<1x32x32xbf16>
    %71 = vector.shape_cast %70 : vector<1x32x32xbf16> to vector<32x32xbf16>
    %cst_43 = arith.constant dense<0.000000e+00> : vector<42x32xf32>
    %72 = tpu.matmul %69, %71, %cst_43 {dimension_numbers = #tpu.dot_dimension_numbers<[1], [0], [0], [1], [0, 0, 1, 1], [], []>} : vector<42x32xbf16>, vector<32x32xbf16>, vector<42x32xf32> -> vector<42x32xf32>
    %73 = vector.extract_strided_slice %68 {offsets = [1, 0], sizes = [42, 32], strides = [1, 1]} : vector<46x32xbf16> to vector<42x32xbf16>
    %c1_44 = arith.constant 1 : index
    %c0_45 = arith.constant 0 : index
    %c0_46 = arith.constant 0 : index
    %74 = vector.load %arg7[%c1_44, %c0_45, %c0_46] : memref<15x32x32xbf16, #tpu.memory_space<vmem>>, vector<1x32x32xbf16>
    %75 = vector.shape_cast %74 : vector<1x32x32xbf16> to vector<32x32xbf16>
    %cst_47 = arith.constant dense<0.000000e+00> : vector<42x32xf32>
    %76 = tpu.matmul %73, %75, %cst_47 {dimension_numbers = #tpu.dot_dimension_numbers<[1], [0], [0], [1], [0, 0, 1, 1], [], []>} : vector<42x32xbf16>, vector<32x32xbf16>, vector<42x32xf32> -> vector<42x32xf32>
    %77 = arith.addf %72, %76 : vector<42x32xf32>
    %78 = vector.extract_strided_slice %68 {offsets = [2, 0], sizes = [42, 32], strides = [1, 1]} : vector<46x32xbf16> to vector<42x32xbf16>
    %c2_48 = arith.constant 2 : index
    %c0_49 = arith.constant 0 : index
    %c0_50 = arith.constant 0 : index
    %79 = vector.load %arg7[%c2_48, %c0_49, %c0_50] : memref<15x32x32xbf16, #tpu.memory_space<vmem>>, vector<1x32x32xbf16>
    %80 = vector.shape_cast %79 : vector<1x32x32xbf16> to vector<32x32xbf16>
    %cst_51 = arith.constant dense<0.000000e+00> : vector<42x32xf32>
    %81 = tpu.matmul %78, %80, %cst_51 {dimension_numbers = #tpu.dot_dimension_numbers<[1], [0], [0], [1], [0, 0, 1, 1], [], []>} : vector<42x32xbf16>, vector<32x32xbf16>, vector<42x32xf32> -> vector<42x32xf32>
    %82 = arith.addf %77, %81 : vector<42x32xf32>
    %83 = vector.extract_strided_slice %68 {offsets = [3, 0], sizes = [42, 32], strides = [1, 1]} : vector<46x32xbf16> to vector<42x32xbf16>
    %c3 = arith.constant 3 : index
    %c0_52 = arith.constant 0 : index
    %c0_53 = arith.constant 0 : index
    %84 = vector.load %arg7[%c3, %c0_52, %c0_53] : memref<15x32x32xbf16, #tpu.memory_space<vmem>>, vector<1x32x32xbf16>
    %85 = vector.shape_cast %84 : vector<1x32x32xbf16> to vector<32x32xbf16>
    %cst_54 = arith.constant dense<0.000000e+00> : vector<42x32xf32>
    %86 = tpu.matmul %83, %85, %cst_54 {dimension_numbers = #tpu.dot_dimension_numbers<[1], [0], [0], [1], [0, 0, 1, 1], [], []>} : vector<42x32xbf16>, vector<32x32xbf16>, vector<42x32xf32> -> vector<42x32xf32>
    %87 = arith.addf %82, %86 : vector<42x32xf32>
    %88 = vector.extract_strided_slice %68 {offsets = [4, 0], sizes = [42, 32], strides = [1, 1]} : vector<46x32xbf16> to vector<42x32xbf16>
    %c4 = arith.constant 4 : index
    %c0_55 = arith.constant 0 : index
    %c0_56 = arith.constant 0 : index
    %89 = vector.load %arg7[%c4, %c0_55, %c0_56] : memref<15x32x32xbf16, #tpu.memory_space<vmem>>, vector<1x32x32xbf16>
    %90 = vector.shape_cast %89 : vector<1x32x32xbf16> to vector<32x32xbf16>
    %cst_57 = arith.constant dense<0.000000e+00> : vector<42x32xf32>
    %91 = tpu.matmul %88, %90, %cst_57 {dimension_numbers = #tpu.dot_dimension_numbers<[1], [0], [0], [1], [0, 0, 1, 1], [], []>} : vector<42x32xbf16>, vector<32x32xbf16>, vector<42x32xf32> -> vector<42x32xf32>
    %92 = arith.addf %87, %91 : vector<42x32xf32>
    %c0_58 = arith.constant 0 : index
    %c0_59 = arith.constant 0 : index
    %c0_60 = arith.constant 0 : index
    %93 = vector.load %arg8[%c0_58, %c0_59, %c0_60] : memref<3x1x32xf32, #tpu.memory_space<vmem>>, vector<1x1x32xf32>
    %94 = vector.shape_cast %93 : vector<1x1x32xf32> to vector<1x32xf32>
    %95 = vector.broadcast %94 : vector<1x32xf32> to vector<42x32xf32>
    %96 = arith.addf %92, %95 : vector<42x32xf32>
    %cst_61 = arith.constant 0.000000e+00 : f32
    %97 = vector.broadcast %cst_61 : f32 to vector<42x32xf32>
    %98 = arith.maximumf %96, %97 : vector<42x32xf32>
    %c0_62 = arith.constant 0 : index
    %c0_63 = arith.constant 0 : index
    %c0_64 = arith.constant 0 : index
    %99 = vector.load %arg9[%c0_62, %c0_63, %c0_64] : memref<3x1x32xf32, #tpu.memory_space<vmem>>, vector<1x1x32xf32>
    %100 = vector.shape_cast %99 : vector<1x1x32xf32> to vector<1x32xf32>
    %101 = vector.broadcast %100 : vector<1x32xf32> to vector<42x32xf32>
    %102 = arith.mulf %98, %101 : vector<42x32xf32>
    %c0_65 = arith.constant 0 : index
    %c0_66 = arith.constant 0 : index
    %c0_67 = arith.constant 0 : index
    %103 = vector.load %arg10[%c0_65, %c0_66, %c0_67] : memref<3x1x32xf32, #tpu.memory_space<vmem>>, vector<1x1x32xf32>
    %104 = vector.shape_cast %103 : vector<1x1x32xf32> to vector<1x32xf32>
    %105 = vector.broadcast %104 : vector<1x32xf32> to vector<42x32xf32>
    %106 = arith.addf %102, %105 : vector<42x32xf32>
    %107 = arith.truncf %106 : vector<42x32xf32> to vector<42x32xbf16>
    %108 = vector.extract_strided_slice %107 {offsets = [0, 0], sizes = [38, 32], strides = [1, 1]} : vector<42x32xbf16> to vector<38x32xbf16>
    %c5 = arith.constant 5 : index
    %c0_68 = arith.constant 0 : index
    %c0_69 = arith.constant 0 : index
    %109 = vector.load %arg7[%c5, %c0_68, %c0_69] : memref<15x32x32xbf16, #tpu.memory_space<vmem>>, vector<1x32x32xbf16>
    %110 = vector.shape_cast %109 : vector<1x32x32xbf16> to vector<32x32xbf16>
    %cst_70 = arith.constant dense<0.000000e+00> : vector<38x32xf32>
    %111 = tpu.matmul %108, %110, %cst_70 {dimension_numbers = #tpu.dot_dimension_numbers<[1], [0], [0], [1], [0, 0, 1, 1], [], []>} : vector<38x32xbf16>, vector<32x32xbf16>, vector<38x32xf32> -> vector<38x32xf32>
    %112 = vector.extract_strided_slice %107 {offsets = [1, 0], sizes = [38, 32], strides = [1, 1]} : vector<42x32xbf16> to vector<38x32xbf16>
    %c6 = arith.constant 6 : index
    %c0_71 = arith.constant 0 : index
    %c0_72 = arith.constant 0 : index
    %113 = vector.load %arg7[%c6, %c0_71, %c0_72] : memref<15x32x32xbf16, #tpu.memory_space<vmem>>, vector<1x32x32xbf16>
    %114 = vector.shape_cast %113 : vector<1x32x32xbf16> to vector<32x32xbf16>
    %cst_73 = arith.constant dense<0.000000e+00> : vector<38x32xf32>
    %115 = tpu.matmul %112, %114, %cst_73 {dimension_numbers = #tpu.dot_dimension_numbers<[1], [0], [0], [1], [0, 0, 1, 1], [], []>} : vector<38x32xbf16>, vector<32x32xbf16>, vector<38x32xf32> -> vector<38x32xf32>
    %116 = arith.addf %111, %115 : vector<38x32xf32>
    %117 = vector.extract_strided_slice %107 {offsets = [2, 0], sizes = [38, 32], strides = [1, 1]} : vector<42x32xbf16> to vector<38x32xbf16>
    %c7 = arith.constant 7 : index
    %c0_74 = arith.constant 0 : index
    %c0_75 = arith.constant 0 : index
    %118 = vector.load %arg7[%c7, %c0_74, %c0_75] : memref<15x32x32xbf16, #tpu.memory_space<vmem>>, vector<1x32x32xbf16>
    %119 = vector.shape_cast %118 : vector<1x32x32xbf16> to vector<32x32xbf16>
    %cst_76 = arith.constant dense<0.000000e+00> : vector<38x32xf32>
    %120 = tpu.matmul %117, %119, %cst_76 {dimension_numbers = #tpu.dot_dimension_numbers<[1], [0], [0], [1], [0, 0, 1, 1], [], []>} : vector<38x32xbf16>, vector<32x32xbf16>, vector<38x32xf32> -> vector<38x32xf32>
    %121 = arith.addf %116, %120 : vector<38x32xf32>
    %122 = vector.extract_strided_slice %107 {offsets = [3, 0], sizes = [38, 32], strides = [1, 1]} : vector<42x32xbf16> to vector<38x32xbf16>
    %c8 = arith.constant 8 : index
    %c0_77 = arith.constant 0 : index
    %c0_78 = arith.constant 0 : index
    %123 = vector.load %arg7[%c8, %c0_77, %c0_78] : memref<15x32x32xbf16, #tpu.memory_space<vmem>>, vector<1x32x32xbf16>
    %124 = vector.shape_cast %123 : vector<1x32x32xbf16> to vector<32x32xbf16>
    %cst_79 = arith.constant dense<0.000000e+00> : vector<38x32xf32>
    %125 = tpu.matmul %122, %124, %cst_79 {dimension_numbers = #tpu.dot_dimension_numbers<[1], [0], [0], [1], [0, 0, 1, 1], [], []>} : vector<38x32xbf16>, vector<32x32xbf16>, vector<38x32xf32> -> vector<38x32xf32>
    %126 = arith.addf %121, %125 : vector<38x32xf32>
    %127 = vector.extract_strided_slice %107 {offsets = [4, 0], sizes = [38, 32], strides = [1, 1]} : vector<42x32xbf16> to vector<38x32xbf16>
    %c9 = arith.constant 9 : index
    %c0_80 = arith.constant 0 : index
    %c0_81 = arith.constant 0 : index
    %128 = vector.load %arg7[%c9, %c0_80, %c0_81] : memref<15x32x32xbf16, #tpu.memory_space<vmem>>, vector<1x32x32xbf16>
    %129 = vector.shape_cast %128 : vector<1x32x32xbf16> to vector<32x32xbf16>
    %cst_82 = arith.constant dense<0.000000e+00> : vector<38x32xf32>
    %130 = tpu.matmul %127, %129, %cst_82 {dimension_numbers = #tpu.dot_dimension_numbers<[1], [0], [0], [1], [0, 0, 1, 1], [], []>} : vector<38x32xbf16>, vector<32x32xbf16>, vector<38x32xf32> -> vector<38x32xf32>
    %131 = arith.addf %126, %130 : vector<38x32xf32>
    %c1_83 = arith.constant 1 : index
    %c0_84 = arith.constant 0 : index
    %c0_85 = arith.constant 0 : index
    %132 = vector.load %arg8[%c1_83, %c0_84, %c0_85] : memref<3x1x32xf32, #tpu.memory_space<vmem>>, vector<1x1x32xf32>
    %133 = vector.shape_cast %132 : vector<1x1x32xf32> to vector<1x32xf32>
    %134 = vector.broadcast %133 : vector<1x32xf32> to vector<38x32xf32>
    %135 = arith.addf %131, %134 : vector<38x32xf32>
    %cst_86 = arith.constant 0.000000e+00 : f32
    %136 = vector.broadcast %cst_86 : f32 to vector<38x32xf32>
    %137 = arith.maximumf %135, %136 : vector<38x32xf32>
    %c1_87 = arith.constant 1 : index
    %c0_88 = arith.constant 0 : index
    %c0_89 = arith.constant 0 : index
    %138 = vector.load %arg9[%c1_87, %c0_88, %c0_89] : memref<3x1x32xf32, #tpu.memory_space<vmem>>, vector<1x1x32xf32>
    %139 = vector.shape_cast %138 : vector<1x1x32xf32> to vector<1x32xf32>
    %140 = vector.broadcast %139 : vector<1x32xf32> to vector<38x32xf32>
    %141 = arith.mulf %137, %140 : vector<38x32xf32>
    %c1_90 = arith.constant 1 : index
    %c0_91 = arith.constant 0 : index
    %c0_92 = arith.constant 0 : index
    %142 = vector.load %arg10[%c1_90, %c0_91, %c0_92] : memref<3x1x32xf32, #tpu.memory_space<vmem>>, vector<1x1x32xf32>
    %143 = vector.shape_cast %142 : vector<1x1x32xf32> to vector<1x32xf32>
    %144 = vector.broadcast %143 : vector<1x32xf32> to vector<38x32xf32>
    %145 = arith.addf %141, %144 : vector<38x32xf32>
    %146 = arith.truncf %145 : vector<38x32xf32> to vector<38x32xbf16>
    %147 = vector.extract_strided_slice %146 {offsets = [0, 0], sizes = [34, 32], strides = [1, 1]} : vector<38x32xbf16> to vector<34x32xbf16>
    %c10 = arith.constant 10 : index
    %c0_93 = arith.constant 0 : index
    %c0_94 = arith.constant 0 : index
    %148 = vector.load %arg7[%c10, %c0_93, %c0_94] : memref<15x32x32xbf16, #tpu.memory_space<vmem>>, vector<1x32x32xbf16>
    %149 = vector.shape_cast %148 : vector<1x32x32xbf16> to vector<32x32xbf16>
    %cst_95 = arith.constant dense<0.000000e+00> : vector<34x32xf32>
    %150 = tpu.matmul %147, %149, %cst_95 {dimension_numbers = #tpu.dot_dimension_numbers<[1], [0], [0], [1], [0, 0, 1, 1], [], []>} : vector<34x32xbf16>, vector<32x32xbf16>, vector<34x32xf32> -> vector<34x32xf32>
    %151 = vector.extract_strided_slice %146 {offsets = [1, 0], sizes = [34, 32], strides = [1, 1]} : vector<38x32xbf16> to vector<34x32xbf16>
    %c11 = arith.constant 11 : index
    %c0_96 = arith.constant 0 : index
    %c0_97 = arith.constant 0 : index
    %152 = vector.load %arg7[%c11, %c0_96, %c0_97] : memref<15x32x32xbf16, #tpu.memory_space<vmem>>, vector<1x32x32xbf16>
    %153 = vector.shape_cast %152 : vector<1x32x32xbf16> to vector<32x32xbf16>
    %cst_98 = arith.constant dense<0.000000e+00> : vector<34x32xf32>
    %154 = tpu.matmul %151, %153, %cst_98 {dimension_numbers = #tpu.dot_dimension_numbers<[1], [0], [0], [1], [0, 0, 1, 1], [], []>} : vector<34x32xbf16>, vector<32x32xbf16>, vector<34x32xf32> -> vector<34x32xf32>
    %155 = arith.addf %150, %154 : vector<34x32xf32>
    %156 = vector.extract_strided_slice %146 {offsets = [2, 0], sizes = [34, 32], strides = [1, 1]} : vector<38x32xbf16> to vector<34x32xbf16>
    %c12 = arith.constant 12 : index
    %c0_99 = arith.constant 0 : index
    %c0_100 = arith.constant 0 : index
    %157 = vector.load %arg7[%c12, %c0_99, %c0_100] : memref<15x32x32xbf16, #tpu.memory_space<vmem>>, vector<1x32x32xbf16>
    %158 = vector.shape_cast %157 : vector<1x32x32xbf16> to vector<32x32xbf16>
    %cst_101 = arith.constant dense<0.000000e+00> : vector<34x32xf32>
    %159 = tpu.matmul %156, %158, %cst_101 {dimension_numbers = #tpu.dot_dimension_numbers<[1], [0], [0], [1], [0, 0, 1, 1], [], []>} : vector<34x32xbf16>, vector<32x32xbf16>, vector<34x32xf32> -> vector<34x32xf32>
    %160 = arith.addf %155, %159 : vector<34x32xf32>
    %161 = vector.extract_strided_slice %146 {offsets = [3, 0], sizes = [34, 32], strides = [1, 1]} : vector<38x32xbf16> to vector<34x32xbf16>
    %c13 = arith.constant 13 : index
    %c0_102 = arith.constant 0 : index
    %c0_103 = arith.constant 0 : index
    %162 = vector.load %arg7[%c13, %c0_102, %c0_103] : memref<15x32x32xbf16, #tpu.memory_space<vmem>>, vector<1x32x32xbf16>
    %163 = vector.shape_cast %162 : vector<1x32x32xbf16> to vector<32x32xbf16>
    %cst_104 = arith.constant dense<0.000000e+00> : vector<34x32xf32>
    %164 = tpu.matmul %161, %163, %cst_104 {dimension_numbers = #tpu.dot_dimension_numbers<[1], [0], [0], [1], [0, 0, 1, 1], [], []>} : vector<34x32xbf16>, vector<32x32xbf16>, vector<34x32xf32> -> vector<34x32xf32>
    %165 = arith.addf %160, %164 : vector<34x32xf32>
    %166 = vector.extract_strided_slice %146 {offsets = [4, 0], sizes = [34, 32], strides = [1, 1]} : vector<38x32xbf16> to vector<34x32xbf16>
    %c14 = arith.constant 14 : index
    %c0_105 = arith.constant 0 : index
    %c0_106 = arith.constant 0 : index
    %167 = vector.load %arg7[%c14, %c0_105, %c0_106] : memref<15x32x32xbf16, #tpu.memory_space<vmem>>, vector<1x32x32xbf16>
    %168 = vector.shape_cast %167 : vector<1x32x32xbf16> to vector<32x32xbf16>
    %cst_107 = arith.constant dense<0.000000e+00> : vector<34x32xf32>
    %169 = tpu.matmul %166, %168, %cst_107 {dimension_numbers = #tpu.dot_dimension_numbers<[1], [0], [0], [1], [0, 0, 1, 1], [], []>} : vector<34x32xbf16>, vector<32x32xbf16>, vector<34x32xf32> -> vector<34x32xf32>
    %170 = arith.addf %165, %169 : vector<34x32xf32>
    %c2_108 = arith.constant 2 : index
    %c0_109 = arith.constant 0 : index
    %c0_110 = arith.constant 0 : index
    %171 = vector.load %arg8[%c2_108, %c0_109, %c0_110] : memref<3x1x32xf32, #tpu.memory_space<vmem>>, vector<1x1x32xf32>
    %172 = vector.shape_cast %171 : vector<1x1x32xf32> to vector<1x32xf32>
    %173 = vector.broadcast %172 : vector<1x32xf32> to vector<34x32xf32>
    %174 = arith.addf %170, %173 : vector<34x32xf32>
    %cst_111 = arith.constant 0.000000e+00 : f32
    %175 = vector.broadcast %cst_111 : f32 to vector<34x32xf32>
    %176 = arith.maximumf %174, %175 : vector<34x32xf32>
    %c2_112 = arith.constant 2 : index
    %c0_113 = arith.constant 0 : index
    %c0_114 = arith.constant 0 : index
    %177 = vector.load %arg9[%c2_112, %c0_113, %c0_114] : memref<3x1x32xf32, #tpu.memory_space<vmem>>, vector<1x1x32xf32>
    %178 = vector.shape_cast %177 : vector<1x1x32xf32> to vector<1x32xf32>
    %179 = vector.broadcast %178 : vector<1x32xf32> to vector<34x32xf32>
    %180 = arith.mulf %176, %179 : vector<34x32xf32>
    %c2_115 = arith.constant 2 : index
    %c0_116 = arith.constant 0 : index
    %c0_117 = arith.constant 0 : index
    %181 = vector.load %arg10[%c2_115, %c0_116, %c0_117] : memref<3x1x32xf32, #tpu.memory_space<vmem>>, vector<1x1x32xf32>
    %182 = vector.shape_cast %181 : vector<1x1x32xf32> to vector<1x32xf32>
    %183 = vector.broadcast %182 : vector<1x32xf32> to vector<34x32xf32>
    %184 = arith.addf %180, %183 : vector<34x32xf32>
    %185 = vector.extract_strided_slice %184 {offsets = [0, 0], sizes = [11, 32], strides = [1, 1]} : vector<34x32xf32> to vector<11x32xf32>
    %186 = vector.extract_strided_slice %184 {offsets = [23, 0], sizes = [11, 32], strides = [1, 1]} : vector<34x32xf32> to vector<11x32xf32>
    %187 = tpu.concatenate %185, %186 in 0 : vector<11x32xf32>, vector<11x32xf32> -> vector<22x32xf32>
    %c0_118 = arith.constant 0 : index
    %c0_119 = arith.constant 0 : index
    %188 = vector.load %arg12[%c0_118, %c0_119] : memref<22x32xf32, #tpu.memory_space<vmem>>, vector<22x32xf32>
    tpu.vector_store %arg12[%c0_118, %c0_119], %187 {strides = array<i32>} : memref<22x32xf32, #tpu.memory_space<vmem>>, vector<22x32xf32>,
    return
  }
  func.func @transform_0(%arg0: i32) -> (i32, i32) {
    %c0_i32 = arith.constant 0 : i32
    %c0_i32_0 = arith.constant 0 : i32
    %c0_i32_1 = arith.constant 0 : i32
    return %c0_i32, %c0_i32_0 : i32, i32
  }
  func.func @transform_1(%arg0: i32) -> (i32, i32) {
    %c0_i32 = arith.constant 0 : i32
    %c0_i32_0 = arith.constant 0 : i32
    %c0_i32_1 = arith.constant 0 : i32
    return %c0_i32, %c0_i32_0 : i32, i32
  }
  func.func @transform_2(%arg0: i32) -> (i32, i32) {
    %c0_i32 = arith.constant 0 : i32
    %c0_i32_0 = arith.constant 0 : i32
    %c0_i32_1 = arith.constant 0 : i32
    return %c0_i32, %c0_i32_0 : i32, i32
  }
  func.func @transform_3(%arg0: i32) -> (i32, i32, i32) {
    %c0_i32 = arith.constant 0 : i32
    %c0_i32_0 = arith.constant 0 : i32
    %c0_i32_1 = arith.constant 0 : i32
    %c0_i32_2 = arith.constant 0 : i32
    return %c0_i32, %c0_i32_0, %c0_i32_1 : i32, i32, i32
  }
  func.func @transform_4(%arg0: i32) -> (i32, i32, i32) {
    %c0_i32 = arith.constant 0 : i32
    %c0_i32_0 = arith.constant 0 : i32
    %c0_i32_1 = arith.constant 0 : i32
    %c0_i32_2 = arith.constant 0 : i32
    return %c0_i32, %c0_i32_0, %c0_i32_1 : i32, i32, i32
  }
  func.func @transform_5(%arg0: i32) -> (i32, i32) {
    %c0_i32 = arith.constant 0 : i32
    %c0_i32_0 = arith.constant 0 : i32
    %c0_i32_1 = arith.constant 0 : i32
    return %c0_i32, %c0_i32_0 : i32, i32
  }
  func.func @transform_6(%arg0: i32) -> (i32, i32, i32) {
    %c0_i32 = arith.constant 0 : i32
    %c0_i32_0 = arith.constant 0 : i32
    %c0_i32_1 = arith.constant 0 : i32
    %c0_i32_2 = arith.constant 0 : i32
    return %c0_i32, %c0_i32_0, %c0_i32_1 : i32, i32, i32
  }
  func.func @transform_7(%arg0: i32) -> (i32, i32, i32) {
    %c0_i32 = arith.constant 0 : i32
    %c0_i32_0 = arith.constant 0 : i32
    %c0_i32_1 = arith.constant 0 : i32
    %c0_i32_2 = arith.constant 0 : i32
    return %c0_i32, %c0_i32_0, %c0_i32_1 : i32, i32, i32
  }
  func.func @transform_8(%arg0: i32) -> (i32, i32, i32) {
    %c0_i32 = arith.constant 0 : i32
    %c0_i32_0 = arith.constant 0 : i32
    %c0_i32_1 = arith.constant 0 : i32
    %c0_i32_2 = arith.constant 0 : i32
    return %c0_i32, %c0_i32_0, %c0_i32_1 : i32, i32, i32
  }
  func.func @transform_9(%arg0: i32) -> (i32, i32, i32) {
    %c0_i32 = arith.constant 0 : i32
    %c0_i32_0 = arith.constant 0 : i32
    %c0_i32_1 = arith.constant 0 : i32
    %c0_i32_2 = arith.constant 0 : i32
    return %c0_i32, %c0_i32_0, %c0_i32_1 : i32, i32, i32
  }
  func.func @transform_10(%arg0: i32) -> (i32, i32) {
    %c0_i32 = arith.constant 0 : i32
    %c0_i32_0 = arith.constant 0 : i32
    %c0_i32_1 = arith.constant 0 : i32
    return %c0_i32, %c0_i32_0 : i32, i32
  }
  func.func @transform_11(%arg0: i32) -> (i32, i32) {
    %c0_i32 = arith.constant 0 : i32
    %c0_i32_0 = arith.constant 0 : i32
    %c0_i32_1 = arith.constant 0 : i32
    return %c0_i32, %c0_i32_0 : i32, i32
  }
}

</mosaic_0001>

<bundles_post_ra>
// kernel: tpu_custom_call.1
= control target key start
LH: loop header
LB: loop body
LE: loop exit
PB: predicated region body
PF: predicated region fallthrough
CT: control target
= control target key end

     0   :  { %17 = vsyncpa [#allocation3], 0  ;;  %s2157_s0 = inlined_call_operand.vmem [shape: bf16[8,32], index: 0, kind: input, shape index: {}]   ;;  %s2158_s1 = inlined_call_operand.vmem [shape: bf16[8,8], index: 1, kind: input, shape index: {}]   ;;  %s2159_s2 = inlined_call_operand.vmem [shape: bf16[8,8], index: 2, kind: input, shape index: {}]   ;;  %s2160_s3 = inlined_call_operand.hbm [shape: bf16[3,32,32], index: 3, kind: input, shape index: {}]   ;;  %s2161_s4 = inlined_call_operand.vmem [shape: f32[3,1,32], index: 4, kind: input, shape index: {}]   ;;  %s2162_s5 = inlined_call_operand.vmem [shape: bf16[46,32], index: 5, kind: input, shape index: {}]   ;;  %s2163_s6 = inlined_call_operand.hbm [shape: bf16[15,32,32], index: 6, kind: input, shape index: {}]   ;;  %s2164_s7 = inlined_call_operand.vmem [shape: f32[3,1,32], index: 7, kind: input, shape index: {}]   ;;  %s2165_s8 = inlined_call_operand.vmem [shape: f32[3,1,32], index: 8, kind: input, shape index: {}]   ;;  %s2166_s9 = inlined_call_operand.vmem [shape: f32[3,1,32], index: 9, kind: input, shape index: {}]   ;;  %s2167_s10 = inlined_call_operand.hbm [shape: f32[8,32], index: 10, kind: output, shape index: {0}]   ;;  %s2168_s11 = inlined_call_operand.hbm [shape: f32[22,32], index: 11, kind: output, shape index: {1}]  }
   0x1   :  { %18 = vsyncpa [#allocation6], 0 }
   0x2   :  { %19 = vsyncpa [#allocation4], 0 }
   0x3   :  { %20 = vsyncpa [#allocation9], 0  ;;  %s31_s19 = sshll.u32 %s2160_s3, 4  ;;  %s1844_s20 = smov [#allocation2]   ;;  %s32_s19 = int_to_ptr.hbm [resolvable:$true] %s31_s19 }
   0x4   :  { %s33_s21 = sshll.u32 %s1844_s20, 4  ;;  %s48_s24 = sshll.u32 %s2163_s6, 4  ;;  %s34_s21 = int_to_ptr.vmem [resolvable:$true] %s33_s21  ;;  %s49_s24 = int_to_ptr.hbm [resolvable:$true] %s48_s24 }
   0x5   :  { %s1845_s25 = smov 64   ;;  %s1846_s26 = smov 4  }
   0x6   :  { %39 = dma.hbm_to_vmem [thread:$0]  %s32_s19, 768, %s34_s21, [#allocation3], %s1845_s25, %s1845_s25, %s1846_s26  }
   0x7   :  { %s1847_s27 = smov [#allocation5]  }
   0x8   :  { %s50_s28 = sshll.u32 %s1847_s27, 4  ;;  %s51_s28 = int_to_ptr.vmem [resolvable:$true] %s50_s28 }
   0x9   :  { %56 = dma.hbm_to_vmem [thread:$0]  %s49_s24, 3840, %s51_s28, [#allocation6], %s1845_s25, %s1845_s25, %s1846_s26  }
   0xa   :  { %1836 = dma.done.wait [#allocation3], 768  }
   0xb   :  { %1837 = vsyncadd [#allocation3], 4294966528 }
   0xc   :  { %1838 = dma.done.wait [#allocation6], 3840  }
   0xd   :  { %1839 = vsyncadd [#allocation6], 4294963456  ;;  %v1676_v0 = vld [vmem:[#allocation2 + $0x8] sm:$0xff]  ;;  %v1675_v1 = vld [vmem:[#allocation2] sm:$0xff]  ;;  %vm94_vm0 = vcmask 261120   ;;  %vm117_vm1 = vcmask 1043456  }
   0xe   :  { %104 = vmatpush.bf16.msra.mxu0 %v1676_v0  ;;  %v72_v2 = vld [vmem:[%s2157_s0] sm:$0xf]  ;;  %vm113_vm2 = vcmask 64512   ;;  %v1678_v16 = vld [vmem:[#allocation2 + $0x18] sm:$0xff]  ;;  %v1677_v17 = vld [vmem:[#allocation2 + $0x10] sm:$0xff]  ;;  %vm467_vm9 = vcmask 1046528  }
   0xf   :  { %v1722_v3 = vld [vmem:[%s2161_s4] ss:$0 sm:$0xff]  ;;  %183 = vmatpush.bf16.msra.mxu2 %v1678_v16  ;;  %v1723_v29 = vld [vmem:[%s2161_s4 + $0x1] ss:$0 sm:$0xff]  ;;  %v1680_v41 = vld [vmem:[#allocation2 + $0x28] sm:$0xff]  ;;  %vm597_vm11 = vcmask 1045504  }
  0x10   :  { %v1929_v10 = vld [vmem:[%s2158_s1] sm:$0xf]  ;;  %v1687_v61 = vld [vmem:[#allocation5 + $0x18] sm:$0xff]  ;;  %v1689_v0 = vld [vmem:[#allocation5 + $0x28] sm:$0xff]  ;;  %vm351_vm10 = vsmask.f32 7424 }
  0x11   :  { %v1679_v42 = vld [vmem:[#allocation2 + $0x20] sm:$0xff]  ;;  %v1957_v63 = vld [vmem:[%s2162_s5 + $0x8] sm:$0xff]  ;;  %vm529_vm12 = vsmask.f32 6400  ;;  %s1848_s0 = smov [#allocation7]   ;;  %s1430_s16 = sshll.u32 %s2167_s10, 4  ;;  %s1431_s16 = int_to_ptr.hbm [resolvable:$true] %s1430_s16 }
  0x12   :  { %105 = vmatpush.bf16.msra.mxu0 %v1675_v1  ;;  %v1724_v54 = vld [vmem:[%s2161_s4 + $0x2] ss:$0 sm:$0xff]  ;;  %v1685_v1 = vld [vmem:[#allocation5 + $0x8] sm:$0xff]  ;;  %s1428_s1 = sshll.u32 %s1848_s0, 4  ;;  %s1440_s22 = sshll.u32 %s2168_s11, 4  ;;  %s1429_s1 = int_to_ptr.vmem [resolvable:$true] %s1428_s1  ;;  %s1441_s22 = int_to_ptr.hbm [resolvable:$true] %s1440_s22 }
  0x13   :  { %184 = vmatpush.bf16.msra.mxu2 %v1677_v17  ;;  %v1952_v62 = vld [vmem:[%s2162_s5] sm:$0xff]  ;;  %s1851_s23 = smov 8  }
  0x15   :  { %1467 = vmatmul.msk.bf16.vlgmr.msra.gmra.mxu0 %vm94_vm0, %v72_v2  ;;  %v1686_v2 = vld [vmem:[#allocation5 + $0x10] sm:$0xff] }
  0x17   :  { %402 = vmatpush.bf16.msrb.mxu2 %v1687_v61  ;;  %v1691_v61 = vld [vmem:[#allocation5 + $0x38] sm:$0xff] }
  0x1b   :  { %403 = vmatpush.bf16.msrb.mxu2 %v1686_v2 }
  0x92   :  { %v107_v4 = vpop.f32.mrf.mxu0 }
  0x93   :  { %v108_v5 = vadd.f32 %v1722_v3, %v107_v4  ;;  %v353_v3 = vshrl.u32 %v1952_v62, 16  ;;  %v355_v4 = vshll.u32 %v1952_v62, 16 }
  0x95   :  { %v111_v6 = vmax.f32 %v108_v5, 0.0  ;;  %v360_v5 = vshll.u32 %v1957_v63, 16 }
  0x97   :  { %v112_v7 = vpack.c.bf16 %v111_v6, %v111_v6 }
  0x99   :  { %v119_v8 = vsel %vm117_vm1, %v112_v7, 0  ;;  %v468_v7 = vrot.slane %v1952_v62, 1 }
  0x9a   :  { %v109_v9 = vpop.f32.mrf.mxu0  ;;  %128 = vmatpush.bf16.msra.mxu1 %v119_v8  ;;  %v469_v8 = vrot.slane %v1957_v63, 1 }
  0x9b   :  { %v357_v9 = vrot.slane %v355_v4, 1 }
  0x9d   :  { %1468 = vmatmul.msk.bf16.vlgmr.msra.gmra.mxu1 %vm113_vm2, %v1929_v10 }
  0x9e   :  { %444 = vmatpush.bf16.msrb.mxu1 %v1685_v1 }
 0x11a   :  { %v130_v11 = vpop.f32.mrf.mxu1 }
 0x11b   :  { %v134_v12 = vadd.f32 %v130_v11, %v111_v6  ;;  %v1688_v6 = vld [vmem:[#allocation5 + $0x20] sm:$0xff]  ;;  %v358_v11 = vor.u32 %v357_v9, %v353_v3 }
 0x11d   :  { %v135_v13 = vmul.f32 %v134_v12, %v134_v12 }
 0x11f   :  { %v136_v14 = vsel %vm94_vm0, %v135_v13, 0.0 }
 0x120   :  { %137 = vadd.xlane.f32.xlu0 %v136_v14 }
 0x122   :  { %v132_v15 = vpop.f32.mrf.mxu1 }
 0x193   :  { %v138_v18 = vpop.xlane.xlu0 %137 }
 0x194   :  { %v139_v19 = vmax.f32 %v138_v18, 1e-24 }
 0x196   :  { %1734 = vrsqrt.f32 %v139_v19  ;;  %vm146_vm4 = vweird.f32 %v139_v19 }
 0x19c   :  { %v1735_v20 = vpop.eup %1734 }
 0x19d   :  { %v141_v21 = vmul.f32 %v1735_v20, %v139_v19  ;;  %vm147_vm3 = vweird.f32 %v1735_v20  ;;  %v1684_v19 = vld [vmem:[#allocation5] sm:$0xff] }
 0x19e   :  { %vm148_vm5 = vmor %vm146_vm4, %vm147_vm3  ;;  %445 = vmatpush.bf16.msrb.mxu1 %v1684_v19  ;;  %vm1421_vm3 = vcmask 259072  }
 0x19f   :  { %v142_v22 = vmul.f32 %v1735_v20, %v141_v21  ;;  %v1683_v21 = vld [vmem:[%s2162_s5 + $0x10] sm:$0x70] }
 0x1a1   :  { %v143_v23 = vmul.f32 0.5, %v142_v22  ;;  %1523 = vmatmul.msk.bf16.vlgmr.msrb.gmra.mxu1 %vm94_vm0, %v1952_v62 }
 0x1a3   :  { %v144_v24 = vsub.f32 1.5, %v143_v23  ;;  %v364_v23 = vshrl.u32 %v1957_v63, 16 }
 0x1a5   :  { %v145_v25 = vmul.f32 %v1735_v20, %v144_v24 }
 0x1a7   :  { %v149_v26 = vsel %vm148_vm5, %v1735_v20, %v145_v25  ;;  %v1502_v20 = vld [vmem:[%s2162_s5 + $0x10] sm:$0xf]  ;;  %s1850_s5 = smov 128  }
 0x1a8   :  { %v150_v27 = vmul.f32 %v149_v26, %v134_v12  ;;  %v470_v12 = vsel %vm467_vm9, %v468_v7, %v469_v8  ;;  %v1981_v22 = vor.u32 %v1683_v21, %v1502_v20  ;;  %v2024_v21 = vld [vmem:[%s2164_s7] ss:$0 sm:$0xff] }
 0x1aa   :  { %v151_v28 = vpack.c.bf16 %v150_v27, %v150_v27  ;;  %v368_v24 = vshll.u32 %v1981_v22, 16 }
 0x1ac   :  { %1478 = vmatmul.msk.bf16.vlgmr.msra.gmra.mxu2 %vm94_vm0, %v151_v28  ;;  %v370_v26 = vrot.slane %v368_v24, 1  ;;  %v471_v28 = vrot.slane %v1981_v22, 1 }
 0x1b1   :  { %1524 = vmatmul.msk.bf16.gmra.mxu1 %vm94_vm0, %v1957_v63 }
 0x1c1   :  { %1525 = vmatmul.msk.bf16.gmra.mxu1 %vm94_vm0, %v1981_v22 }
 0x22f   :  { %v186_v30 = vpop.f32.mrf.mxu2 }
 0x230   :  { %v187_v31 = vadd.f32 %v1723_v29, %v186_v30  ;;  %v472_v29 = vsel %vm467_vm9, %v469_v8, %v471_v28  ;;  %v372_v30 = vshrl.u32 %v1981_v22, 16 }
 0x232   :  { %v190_v32 = vmax.f32 %v187_v31, 0.0  ;;  %v374_v31 = vor.u32 %v372_v30, %v370_v26 }
 0x234   :  { %v191_v33 = vpack.c.bf16 %v190_v32, %v190_v32 }
 0x236   :  { %v193_v34 = vsel %vm117_vm1, %v191_v33, 0  ;;  %v534_v33 = vrot.slane %v360_v5, 2 }
 0x237   :  { %v188_v35 = vpop.f32.mrf.mxu2  ;;  %202 = vmatpush.bf16.msrb.mxu0 %v193_v34  ;;  %v533_v34 = vrot.slane %v364_v23, 1 }
 0x238   :  { %v1692_v35 = vld [vmem:[#allocation5 + $0x40] sm:$0xff] }
 0x23a   :  { %1479 = vmatmul.msk.bf16.vlgmr.msrb.gmra.mxu0 %vm113_vm2, %v1929_v10 }
 0x23b   :  { %257 = vmatpush.bf16.msra.mxu0 %v1680_v41  ;;  %v535_v41 = vor.u32 %v534_v33, %v533_v34  ;;  %v1698_v34 = vld [vmem:[#allocation5 + $0x70] sm:$0xff] }
 0x23f   :  { %258 = vmatpush.bf16.msra.mxu0 %v1679_v42 }
 0x2b7   :  { %v204_v36 = vpop.f32.mrf.mxu0 }
 0x2b8   :  { %v208_v37 = vadd.f32 %v204_v36, %v190_v32  ;;  %v1693_v32 = vld [vmem:[#allocation5 + $0x48] sm:$0xff]  ;;  %v530_v36 = vrot.slane %v353_v3, 1 }
 0x2b9   :  { %630 = vmatpush.bf16.msra.mxu2 %v1693_v32 }
 0x2ba   :  { %v209_v38 = vmul.f32 %v208_v37, %v208_v37 }
 0x2bc   :  { %v210_v39 = vsel %vm94_vm0, %v209_v38, 0.0  ;;  %v599_v38 = vrot.slane %v1957_v63, 2  ;;  %v300_v63 = vld [vmem:[%s2159_s2] sm:$0xf] }
 0x2bd   :  { %211 = vadd.xlane.f32.xlu0 %v210_v39  ;;  %631 = vmatpush.bf16.msra.mxu2 %v1692_v35  ;;  %v1701_v35 = vld [vmem:[#allocation5 + $0x88] sm:$0xff] }
 0x2bf   :  { %v206_v40 = vpop.f32.mrf.mxu0 }
 0x2c0   :  { %v531_v40 = vrot.slane %v355_v4, 2 }
 0x330   :  { %v212_v43 = vpop.xlane.xlu0 %211 }
 0x331   :  { %v213_v44 = vmax.f32 %v212_v43, 1e-24 }
 0x333   :  { %1736 = vrsqrt.f32 %v213_v44  ;;  %vm220_vm7 = vweird.f32 %v213_v44 }
 0x339   :  { %v1737_v45 = vpop.eup %1736 }
 0x33a   :  { %v215_v46 = vmul.f32 %v1737_v45, %v213_v44  ;;  %vm221_vm6 = vweird.f32 %v1737_v45  ;;  %v532_v44 = vor.u32 %v531_v40, %v530_v36  ;;  %v1696_v40 = vld [vmem:[#allocation5 + $0x60] sm:$0xff] }
 0x33b   :  { %vm222_vm8 = vmor %vm220_vm7, %vm221_vm6 }
 0x33c   :  { %v216_v47 = vmul.f32 %v1737_v45, %v215_v46 }
 0x33e   :  { %v217_v48 = vmul.f32 0.5, %v216_v47 }
 0x340   :  { %v218_v49 = vsub.f32 1.5, %v217_v48  ;;  %v537_v48 = vrot.slane %v372_v30, 1 }
 0x342   :  { %v219_v50 = vmul.f32 %v1737_v45, %v218_v49 }
 0x344   :  { %v223_v51 = vsel %vm222_vm8, %v1737_v45, %v219_v50  ;;  %v536_v45 = vsel %vm529_vm12, %v532_v44, %v535_v41  ;;  %v601_v50 = vrot.slane %v1981_v22, 2  ;;  %v1700_v44 = vld [vmem:[#allocation5 + $0x80] sm:$0xff] }
 0x345   :  { %v224_v52 = vmul.f32 %v223_v51, %v208_v37  ;;  %v598_v37 = vrot.slane %v1952_v62, 2  ;;  %v538_v51 = vrot.slane %v368_v24, 2 }
 0x347   :  { %v225_v53 = vpack.c.bf16 %v224_v52, %v224_v52  ;;  %v600_v39 = vsel %vm597_vm11, %v598_v37, %v599_v38 }
 0x349   :  { %1489 = vmatmul.msk.bf16.vlgmr.msra.gmra.mxu0 %vm94_vm0, %v225_v53  ;;  %v602_v53 = vsel %vm597_vm11, %v599_v38, %v601_v50  ;;  %v2036_v38 = vld [vmem:[%s2166_s9] ss:$0 sm:$0xff] }
 0x3c6   :  { %v260_v55 = vpop.f32.mrf.mxu0 }
 0x3c7   :  { %v261_v56 = vadd.f32 %v1724_v54, %v260_v55  ;;  %v539_v54 = vor.u32 %v538_v51, %v537_v48 }
 0x3c9   :  { %v264_v57 = vmax.f32 %v261_v56, 0.0  ;;  %v540_v56 = vsel %vm529_vm12, %v535_v41, %v539_v54 }
 0x3cb   :  { %v265_v58 = vpack.c.bf16 %v264_v57, %v264_v57 }
 0x3cd   :  { %v267_v59 = vsel %vm117_vm1, %v265_v58, 0 }
 0x3ce   :  { %v262_v60 = vpop.f32.mrf.mxu0  ;;  %276 = vmatpush.bf16.msra.mxu3 %v267_v59 }
 0x3d1   :  { %1490 = vmatmul.msk.bf16.vlgmr.msra.gmra.mxu3 %vm113_vm2, %v1929_v10  ;;  %v362_v10 = vrot.slane %v360_v5, 1 }
 0x3d2   :  { %500 = vmatpush.bf16.msrb.mxu3 %v1689_v0  ;;  %v1690_v0 = vld [vmem:[#allocation5 + $0x30] sm:$0xff] }
 0x3d3   :  { %v363_v13 = vsel %vm351_vm10, %v358_v11, %v362_v10  ;;  %v366_v25 = vor.u32 %v364_v23, %v362_v10  ;;  %v1695_v10 = vld [vmem:[#allocation5 + $0x58] sm:$0xff]  ;;  %v1694_v11 = vld [vmem:[#allocation5 + $0x50] sm:$0xff] }
 0x3d4   :  { %1512 = vmatmul.msk.bf16.vlgmr.msrb.gmra.mxu2 %vm94_vm0, %v363_v13 }
 0x3d5   :  { %v371_v27 = vsel %vm351_vm10, %v366_v25, %v370_v26  ;;  %937 = vmatpush.bf16.msrb.mxu2 %v1701_v35 }
 0x3d6   :  { %501 = vmatpush.bf16.msrb.mxu3 %v1688_v6  ;;  %v447_v6 = vpop.f32.mrf.mxu1 }
 0x3d9   :  { %938 = vmatpush.bf16.msrb.mxu2 %v1700_v44 }
 0x3da   :  { %810 = vmatpush.bf16.msra.mxu3 %v1695_v10 }
 0x3de   :  { %811 = vmatpush.bf16.msra.mxu3 %v1694_v11 }
 0x3e1   :  { %1534 = vmatmul.msk.bf16.vlgmr.msrb.gmra.mxu3 %vm94_vm0, %v470_v12  ;;  %v449_v12 = vpop.f32.mrf.mxu1 }
 0x3e4   :  { %1513 = vmatmul.msk.bf16.gmra.mxu2 %vm94_vm0, %v371_v27  ;;  %v1699_v27 = vld [vmem:[#allocation5 + $0x78] sm:$0xff] }
 0x3e9   :  { %v452_v22 = vpop.f32.mrf.mxu1 }
 0x3f1   :  { %1535 = vmatmul.msk.bf16.gmra.mxu3 %vm94_vm0, %v472_v29  ;;  %v454_v41 = vpop.f32.mrf.mxu1 }
 0x3f4   :  { %1514 = vmatmul.msk.bf16.gmra.mxu2 %vm94_vm0, %v374_v31  ;;  %v2030_v31 = vld [vmem:[%s2165_s8] ss:$0 sm:$0xff] }
 0x401   :  { %1536 = vmatmul.msk.bf16.gmra.mxu3 %vm94_vm0, %v471_v28 }
 0x404   :  { %1556 = vmatmul.msk.bf16.vlgmr.msra.gmra.mxu2 %vm94_vm0, %v600_v39 }
 0x414   :  { %1557 = vmatmul.msk.bf16.gmra.mxu2 %vm94_vm0, %v602_v53 }
 0x424   :  { %1558 = vmatmul.msk.bf16.gmra.mxu2 %vm94_vm0, %v601_v50 }
 0x454   :  { %v278_v14 = vpop.f32.mrf.mxu3 }
 0x455   :  { %v1968_v15 = vadd.f32 %v278_v14, %v264_v57 }
 0x457   :  { %v283_v16 = vmul.f32 %v1968_v15, %v1968_v15  ;;  %v405_v1 = vpop.f32.mrf.mxu2 }
 0x459   :  { %v284_v17 = vsel %vm94_vm0, %v283_v16, 0.0  ;;  %v448_v16 = vadd.f32 %v447_v6, %v405_v1 }
 0x45a   :  { %285 = vadd.xlane.f32.xlu1 %v284_v17 }
 0x45c   :  { %v280_v18 = vpop.f32.mrf.mxu3 }
 0x45f   :  { %v407_v2 = vpop.f32.mrf.mxu2 }
 0x460   :  { %v450_v24 = vadd.f32 %v449_v12, %v407_v2 }
 0x464   :  { %v503_v9 = vpop.f32.mrf.mxu3 }
 0x465   :  { %v518_v18 = vadd.f32 %v503_v9, %v448_v16  ;;  %v1703_v9 = vld [vmem:[#allocation5 + $0x98] sm:$0xff] }
 0x467   :  { %v410_v3 = vpop.f32.mrf.mxu2 }
 0x468   :  { %v453_v36 = vadd.f32 %v452_v22, %v410_v3 }
 0x46c   :  { %v505_v17 = vpop.f32.mrf.mxu3 }
 0x46d   :  { %v519_v29 = vadd.f32 %v505_v17, %v450_v24 }
 0x46f   :  { %v412_v4 = vpop.f32.mrf.mxu2 }
 0x474   :  { %v508_v28 = vpop.f32.mrf.mxu3 }
 0x477   :  { %v2016_v5 = vpop.f32.mrf.mxu2 }
 0x47c   :  { %v510_v48 = vpop.f32.mrf.mxu3 }
 0x47f   :  { %v2018_v7 = vpop.f32.mrf.mxu2 }
 0x484   :  { %v513_v3 = vpop.f32.mrf.mxu3 }
 0x487   :  { %v633_v14 = vpop.f32.mrf.mxu2 }
 0x48f   :  { %v635_v23 = vpop.f32.mrf.mxu2 }
 0x4cd   :  { %v286_v42 = vpop.xlane.xlu1 %285 }
 0x4ce   :  { %v287_v43 = vmax.f32 %v286_v42, 1e-24  ;;  %v638_v42 = vpop.f32.mrf.mxu2 }
 0x4d0   :  { %1738 = vrsqrt.f32 %v287_v43  ;;  %vm294_vm14 = vweird.f32 %v287_v43 }
 0x4d6   :  { %v1739_v46 = vpop.eup %1738 }
 0x4d7   :  { %v289_v47 = vmul.f32 %v1739_v46, %v287_v43  ;;  %vm295_vm13 = vweird.f32 %v1739_v46 }
 0x4d8   :  { %vm296_vm15 = vmor %vm294_vm14, %vm295_vm13 }
 0x4d9   :  { %v290_v49 = vmul.f32 %v1739_v46, %v289_v47 }
 0x4db   :  { %v291_v52 = vmul.f32 0.5, %v290_v49 }
 0x4dd   :  { %v292_v55 = vsub.f32 1.5, %v291_v52  ;;  %v455_v52 = vadd.f32 %v454_v41, %v412_v4 }
 0x4df   :  { %v293_v57 = vmul.f32 %v1739_v46, %v292_v55 }
 0x4e1   :  { %v297_v58 = vsel %vm296_vm15, %v1739_v46, %v293_v57 }
 0x4e2   :  { %v298_v59 = vmul.f32 %v297_v58, %v1968_v15  ;;  %v1697_v15 = vld [vmem:[#allocation5 + $0x68] sm:$0xff]  ;;  %v457_v58 = vpop.f32.mrf.mxu1 }
 0x4e3   :  { %769 = vmatpush.bf16.msra.mxu1 %v1697_v15  ;;  %v458_v4 = vadd.f32 %v457_v58, %v2016_v5 }
 0x4e4   :  { %v299_v60 = vpack.c.bf16 %v298_v59, %v298_v59  ;;  %v640_v59 = vpop.f32.mrf.mxu2 }
 0x4e5   :  { %v522_v12 = vadd.f32 %v513_v3, %v458_v4 }
 0x4e6   :  { %v305_v62 = vsel %vm117_vm1, %v299_v60, 0  ;;  %v521_v60 = vadd.f32 %v510_v48, %v455_v52 }
 0x4e7   :  { %314 = vmatpush.bf16.msrb.mxu0 %v305_v62  ;;  %770 = vmatpush.bf16.msra.mxu1 %v1696_v40 }
 0x4ea   :  { %1491 = vmatmul.msk.bf16.vlgmr.msrb.gmra.mxu0 %vm113_vm2, %v300_v63  ;;  %v459_v15 = vpop.f32.mrf.mxu1  ;;  %vm1417_vm2 = vcmask 1042432  }
 0x4eb   :  { %568 = vmatpush.bf16.msra.mxu0 %v1691_v61  ;;  %996 = vmatpush.bf16.msrb.mxu1 %v1703_v9 }
 0x4ec   :  { %v643_v11 = vpop.f32.mrf.mxu2 }
 0x4ef   :  { %569 = vmatpush.bf16.msra.mxu0 %v1690_v0 }
 0x4f3   :  { %864 = vmatpush.bf16.msrb.mxu0 %v1699_v27 }
 0x4f7   :  { %865 = vmatpush.bf16.msrb.mxu0 %v1698_v34 }
 0x4fa   :  { %1545 = vmatmul.msk.bf16.vlgmr.msra.gmra.mxu0 %vm94_vm0, %v536_v45  ;;  %v520_v45 = vadd.f32 %v508_v28, %v453_v36 }
 0x50a   :  { %1546 = vmatmul.msk.bf16.gmra.mxu0 %vm94_vm0, %v540_v56 }
 0x51a   :  { %1547 = vmatmul.msk.bf16.gmra.mxu0 %vm94_vm0, %v539_v54 }
 0x567   :  { %v316_v8 = vpop.f32.mrf.mxu0 }
 0x568   :  { %320 = vst.msk [vmem:[#allocation7] sm:$0xff] %vm94_vm0, %v316_v8 }
 0x569   :  { %1433 = dma.vmem_to_hbm [thread:$0]  %s1429_s1, 128, %s1431_s16, [#allocation4]  }
 0x56f   :  { %v318_v13 = vpop.f32.mrf.mxu0 }
 0x577   :  { %v571_v19 = vpop.f32.mrf.mxu0 }
 0x578   :  { %v586_v20 = vadd.f32 %v571_v19, %v518_v18  ;;  %v460_v18 = vadd.f32 %v459_v15, %v2018_v7 }
 0x57a   :  { %v648_v25 = vadd.f32 %v633_v14, %v586_v20 }
 0x57c   :  { %v658_v26 = vadd.f32 %v2024_v21, %v648_v25 }
 0x57e   :  { %v664_v30 = vmax.f32 %v658_v26, 0.0 }
 0x57f   :  { %v573_v32 = vpop.f32.mrf.mxu0 }
 0x580   :  { %v587_v33 = vadd.f32 %v573_v32, %v519_v29  ;;  %v674_v37 = vmul.f32 %v2030_v31, %v664_v30 }
 0x582   :  { %v649_v39 = vadd.f32 %v635_v23, %v587_v33  ;;  %v684_v46 = vadd.f32 %v2036_v38, %v674_v37  ;;  %v515_v23 = vpop.f32.mrf.mxu3  ;;  %v645_v33 = vpop.f32.mrf.mxu2 }
 0x583   :  { %v523_v27 = vadd.f32 %v515_v23, %v460_v18 }
 0x584   :  { %v659_v43 = vadd.f32 %v2024_v21, %v649_v39  ;;  %v690_v53 = vpack.c.bf16 %v684_v46, %v684_v46 }
 0x586   :  { %v665_v47 = vmax.f32 %v659_v43, 0.0  ;;  %v711_v61 = vunpack.c.l.b16 %v690_v53 }
 0x587   :  { %v576_v49 = vpop.f32.mrf.mxu0 }
 0x588   :  { %v675_v50 = vmul.f32 %v2030_v31, %v665_v47  ;;  %v588_v51 = vadd.f32 %v576_v49, %v520_v45 }
 0x58a   :  { %v685_v54 = vadd.f32 %v2036_v38, %v675_v50  ;;  %v650_v55 = vadd.f32 %v638_v42, %v588_v51 }
 0x58c   :  { %v691_v56 = vpack.c.bf16 %v685_v54, %v685_v54  ;;  %v660_v57 = vadd.f32 %v2024_v21, %v650_v55 }
 0x58e   :  { %v712_v62 = vunpack.c.l.b16 %v691_v56  ;;  %v666_v63 = vmax.f32 %v660_v57, 0.0 }
 0x58f   :  { %v578_v0 = vpop.f32.mrf.mxu0 }
 0x590   :  { %v2043_v1 = vpack.c.b16 %v712_v62, %v711_v61  ;;  %v589_v2 = vadd.f32 %v578_v0, %v521_v60  ;;  %v676_v6 = vmul.f32 %v2030_v31, %v666_v63  ;;  %v1702_v62 = vld [vmem:[#allocation5 + $0x90] sm:$0xff] }
 0x591   :  { %997 = vmatpush.bf16.msrb.mxu1 %v1702_v62  ;;  %v1708_v62 = vld [vmem:[#allocation5 + $0xc0] sm:$0xff] }
 0x592   :  { %v651_v8 = vadd.f32 %v640_v59, %v589_v2  ;;  %1578 = vmatmul.msk.bf16.vlgmr.msra.gmra.mxu3 %vm94_vm0, %v2043_v1  ;;  %v686_v13 = vadd.f32 %v2036_v38, %v676_v6  ;;  %v722_v24 = vshll.u32 %v2043_v1, 16  ;;  %v720_v34 = vshrl.u32 %v2043_v1, 16 }
 0x593   :  { %v832_v39 = vrot.slane %v2043_v1, 1 }
 0x594   :  { %v661_v10 = vadd.f32 %v2024_v21, %v651_v8  ;;  %v692_v19 = vpack.c.bf16 %v686_v13, %v686_v13  ;;  %v724_v35 = vrot.slane %v722_v24, 1  ;;  %v894_v46 = vrot.slane %v720_v34, 1 }
 0x595   :  { %v895_v47 = vrot.slane %v722_v24, 2 }
 0x596   :  { %v667_v14 = vmax.f32 %v661_v10, 0.0  ;;  %v713_v28 = vunpack.c.l.b16 %v692_v19  ;;  %v725_v44 = vor.u32 %v724_v35, %v720_v34 }
 0x597   :  { %v581_v16 = vpop.f32.mrf.mxu0  ;;  %v896_v57 = vor.u32 %v895_v47, %v894_v46 }
 0x598   :  { %v677_v17 = vmul.f32 %v2030_v31, %v667_v14  ;;  %v590_v5 = vadd.f32 %v581_v16, %v522_v12 }
 0x59a   :  { %v687_v20 = vadd.f32 %v2036_v38, %v677_v17  ;;  %v652_v22 = vadd.f32 %v643_v11, %v590_v5  ;;  %v964_v5 = vrot.slane %v2043_v1, 2 }
 0x59c   :  { %v693_v25 = vpack.c.bf16 %v687_v20, %v687_v20  ;;  %v662_v26 = vadd.f32 %v2024_v21, %v652_v22 }
 0x59e   :  { %v714_v29 = vunpack.c.l.b16 %v693_v25  ;;  %v668_v30 = vmax.f32 %v662_v26, 0.0 }
 0x59f   :  { %v583_v32 = vpop.f32.mrf.mxu0 }
 0x5a0   :  { %v2057_v7 = vpack.c.b16 %v714_v29, %v713_v28  ;;  %v678_v36 = vmul.f32 %v2030_v31, %v668_v30  ;;  %v591_v37 = vadd.f32 %v583_v32, %v523_v27 }
 0x5a2   :  { %v688_v40 = vadd.f32 %v2036_v38, %v678_v36  ;;  %v653_v41 = vadd.f32 %v645_v33, %v591_v37  ;;  %1579 = vmatmul.msk.bf16.gmra.mxu3 %vm94_vm0, %v2057_v7  ;;  %v833_v42 = vrot.slane %v2057_v7, 1  ;;  %v727_v43 = vshll.u32 %v2057_v7, 16 }
 0x5a3   :  { %v731_v45 = vshrl.u32 %v2057_v7, 16  ;;  %v965_v17 = vrot.slane %v2057_v7, 2 }
 0x5a4   :  { %v694_v48 = vpack.c.bf16 %v688_v40, %v688_v40  ;;  %v663_v49 = vadd.f32 %v2024_v21, %v653_v41  ;;  %v834_v50 = vsel %vm467_vm9, %v832_v39, %v833_v42  ;;  %v729_v51 = vrot.slane %v727_v43, 1 }
 0x5a5   :  { %1589 = vmatmul.msk.bf16.vlgmr.msrb.gmra.mxu0 %vm94_vm0, %v834_v50  ;;  %v897_v52 = vrot.slane %v731_v45, 1  ;;  %v898_v53 = vrot.slane %v727_v43, 2  ;;  %v966_v18 = vsel %vm597_vm11, %v964_v5, %v965_v17  ;;  %v1704_v43 = vld [vmem:[#allocation5 + $0xa0] sm:$0xff] }
 0x5a6   :  { %v715_v54 = vunpack.c.l.b16 %v694_v48  ;;  %v669_v55 = vmax.f32 %v663_v49, 0.0  ;;  %v730_v56 = vsel %vm351_vm10, %v725_v44, %v729_v51  ;;  %v733_v10 = vor.u32 %v731_v45, %v729_v51  ;;  %v1707_v45 = vld [vmem:[#allocation5 + $0xb8] sm:$0xff]  ;;  %v2100_v51 = vld [vmem:[%s2164_s7 + $0x1] ss:$0 sm:$0xff] }
 0x5a7   :  { %1567 = vmatmul.msk.bf16.vlgmr.msra.gmra.mxu1 %vm94_vm0, %v730_v56  ;;  %v899_v58 = vor.u32 %v898_v53, %v897_v52  ;;  %1131 = vmatpush.bf16.msrb.mxu3 %v1707_v45 }
 0x5a8   :  { %v679_v59 = vmul.f32 %v2030_v31, %v669_v55  ;;  %v718_v61 = vpack.c.b16 %v715_v54, %v715_v54 }
 0x5a9   :  { %v900_v60 = vsel %vm529_vm12, %v896_v57, %v899_v58  ;;  %v1709_v57 = vld [vmem:[#allocation5 + $0xc8] sm:$0xff] }
 0x5aa   :  { %v689_v21 = vadd.f32 %v2036_v38, %v679_v59  ;;  %1600 = vmatmul.msk.bf16.vlgmr.msrb.gmra.mxu2 %vm94_vm0, %v900_v60  ;;  %v735_v2 = vshll.u32 %v718_v61, 16  ;;  %v835_v4 = vrot.slane %v718_v61, 1  ;;  %v739_v15 = vshrl.u32 %v718_v61, 16  ;;  %v1729_v60 = vld [vmem:[%s2165_s8 + $0x1] ss:$0 sm:$0xff] }
 0x5ab   :  { %1226 = vmatpush.bf16.msra.mxu2 %v1709_v57 }
 0x5ac   :  { %v695_v63 = vpack.c.bf16 %v689_v21, %v689_v21  ;;  %v737_v6 = vrot.slane %v735_v2, 1  ;;  %v836_v31 = vsel %vm467_vm9, %v833_v42, %v835_v4  ;;  %v1705_v42 = vld [vmem:[#allocation5 + $0xa8] sm:$0xff] }
 0x5ad   :  { %1172 = vmatpush.bf16.msra.mxu0 %v1705_v42 }
 0x5ae   :  { %v892_v0 = vunpack.c.l.b16 %v695_v63  ;;  %v738_v12 = vsel %vm351_vm10, %v733_v10, %v737_v6  ;;  %v741_v16 = vor.u32 %v739_v15, %v737_v6  ;;  %v1711_v63 = vld [vmem:[#allocation5 + $0xd8] sm:$0xff]  ;;  %v1706_v6 = vld [vmem:[#allocation5 + $0xb0] sm:$0xff] }
 0x5af   :  { %1227 = vmatpush.bf16.msra.mxu2 %v1708_v62  ;;  %1291 = vmatpush.bf16.msra.mxu1 %v1711_v63 }
 0x5b0   :  { %v893_v3 = vpack.c.b16 %v892_v0, %v715_v54  ;;  %1132 = vmatpush.bf16.msrb.mxu3 %v1706_v6 }
 0x5b1   :  { %1173 = vmatpush.bf16.msra.mxu0 %v1704_v43 }
 0x5b2   :  { %1580 = vmatmul.msk.bf16.gmra.mxu3 %vm94_vm0, %v718_v61  ;;  %v902_v8 = vshrl.u32 %v893_v3, 16  ;;  %v905_v9 = vshll.u32 %v893_v3, 16  ;;  %v967_v19 = vrot.slane %v893_v3, 2  ;;  %v1730_v3 = vld [vmem:[%s2166_s9 + $0x1] ss:$0 sm:$0xff] }
 0x5b4   :  { %v904_v11 = vrot.slane %v902_v8, 1  ;;  %v907_v38 = vrot.slane %v905_v9, 2  ;;  %v968_v20 = vsel %vm597_vm11, %v965_v17, %v967_v19  ;;  %v1710_v9 = vld [vmem:[#allocation5 + $0xd0] sm:$0xff] }
 0x5b5   :  { %1590 = vmatmul.msk.bf16.gmra.mxu0 %vm94_vm0, %v836_v31  ;;  %1292 = vmatpush.bf16.msra.mxu1 %v1710_v9 }
 0x5b6   :  { %v908_v13 = vor.u32 %v907_v38, %v904_v11 }
 0x5b7   :  { %1568 = vmatmul.msk.bf16.gmra.mxu1 %vm94_vm0, %v738_v12 }
 0x5b8   :  { %v909_v14 = vsel %vm529_vm12, %v899_v58, %v908_v13 }
 0x5ba   :  { %1601 = vmatmul.msk.bf16.gmra.mxu2 %vm94_vm0, %v909_v14 }
 0x5c5   :  { %1591 = vmatmul.msk.bf16.gmra.mxu0 %vm94_vm0, %v835_v4 }
 0x5c7   :  { %1569 = vmatmul.msk.bf16.gmra.mxu1 %vm94_vm0, %v741_v16 }
 0x5ca   :  { %1602 = vmatmul.msk.bf16.gmra.mxu2 %vm94_vm0, %v908_v13 }
 0x5d7   :  { %1611 = vmatmul.msk.bf16.vlgmr.msrb.gmra.mxu1 %vm94_vm0, %v966_v18 }
 0x5e7   :  { %1612 = vmatmul.msk.bf16.gmra.mxu1 %vm94_vm0, %v968_v20 }
 0x5f7   :  { %1613 = vmatmul.msk.bf16.gmra.mxu1 %vm94_vm0, %v967_v19 }
 0x615   :  { %v813_v22 = vpop.f32.mrf.mxu3 }
 0x61d   :  { %v815_v23 = vpop.f32.mrf.mxu3 }
 0x622   :  { %v867_v24 = vpop.f32.mrf.mxu0 }
 0x624   :  { %v772_v25 = vpop.f32.mrf.mxu1 }
 0x625   :  { %v818_v26 = vpop.f32.mrf.mxu3  ;;  %v814_v47 = vadd.f32 %v813_v22, %v772_v25 }
 0x627   :  { %v881_v49 = vadd.f32 %v867_v24, %v814_v47 }
 0x62a   :  { %v869_v27 = vpop.f32.mrf.mxu0 }
 0x62c   :  { %v774_v28 = vpop.f32.mrf.mxu1 }
 0x62d   :  { %v940_v29 = vpop.f32.mrf.mxu2  ;;  %v820_v1 = vpop.f32.mrf.mxu3  ;;  %v816_v53 = vadd.f32 %v815_v23, %v774_v28 }
 0x62e   :  { %v954_v50 = vadd.f32 %v940_v29, %v881_v49 }
 0x62f   :  { %v882_v58 = vadd.f32 %v869_v27, %v816_v53 }
 0x632   :  { %v872_v30 = vpop.f32.mrf.mxu0 }
 0x634   :  { %v777_v32 = vpop.f32.mrf.mxu1 }
 0x635   :  { %v942_v33 = vpop.f32.mrf.mxu2  ;;  %v2093_v34 = vpop.f32.mrf.mxu3  ;;  %v819_v0 = vadd.f32 %v818_v26, %v777_v32 }
 0x636   :  { %v955_v21 = vadd.f32 %v942_v33, %v882_v58 }
 0x637   :  { %v883_v31 = vadd.f32 %v872_v30, %v819_v0 }
 0x63a   :  { %v874_v35 = vpop.f32.mrf.mxu0 }
 0x63c   :  { %v779_v7 = vpop.f32.mrf.mxu1 }
 0x63d   :  { %v945_v36 = vpop.f32.mrf.mxu2  ;;  %v825_v37 = vpop.f32.mrf.mxu3  ;;  %v821_v14 = vadd.f32 %v820_v1, %v779_v7  ;;  %v1713_v1 = vld [vmem:[#allocation5 + $0xe8] sm:$0xff] }
 0x63e   :  { %v956_v38 = vadd.f32 %v945_v36, %v883_v31  ;;  %1350 = vmatpush.bf16.msra.mxu3 %v1713_v1 }
 0x63f   :  { %v884_v19 = vadd.f32 %v874_v35, %v821_v14 }
 0x642   :  { %v2095_v39 = vpop.f32.mrf.mxu0 }
 0x644   :  { %v782_v40 = vpop.f32.mrf.mxu1 }
 0x645   :  { %v947_v41 = vpop.f32.mrf.mxu2  ;;  %v824_v27 = vadd.f32 %v2093_v34, %v782_v40 }
 0x646   :  { %v957_v24 = vadd.f32 %v947_v41, %v884_v19 }
 0x647   :  { %v885_v32 = vadd.f32 %v2095_v39, %v824_v27 }
 0x64a   :  { %v879_v44 = vpop.f32.mrf.mxu0 }
 0x64c   :  { %v784_v46 = vpop.f32.mrf.mxu1 }
 0x64d   :  { %v950_v48 = vpop.f32.mrf.mxu2 }
 0x64e   :  { %v958_v7 = vadd.f32 %v950_v48, %v885_v32 }
 0x654   :  { %v999_v52 = vpop.f32.mrf.mxu1 }
 0x655   :  { %v952_v54 = vpop.f32.mrf.mxu2  ;;  %v1013_v55 = vadd.f32 %v999_v52, %v954_v50 }
 0x657   :  { %v1023_v56 = vadd.f32 %v2100_v51, %v1013_v55 }
 0x659   :  { %v1028_v59 = vmax.f32 %v1023_v56, 0.0 }
 0x65b   :  { %v1038_v2 = vmul.f32 %v1729_v60, %v1028_v59 }
 0x65c   :  { %v1001_v61 = vpop.f32.mrf.mxu1 }
 0x65d   :  { %v1014_v4 = vadd.f32 %v1001_v61, %v955_v21  ;;  %v1048_v10 = vadd.f32 %v1730_v3, %v1038_v2 }
 0x65f   :  { %v1024_v8 = vadd.f32 %v2100_v51, %v1014_v4  ;;  %v1053_v15 = vpack.c.bf16 %v1048_v10, %v1048_v10 }
 0x661   :  { %v1029_v11 = vmax.f32 %v1024_v8, 0.0  ;;  %v1073_v20 = vunpack.c.l.b16 %v1053_v15 }
 0x663   :  { %v1039_v12 = vmul.f32 %v1729_v60, %v1029_v11 }
 0x664   :  { %v1004_v13 = vpop.f32.mrf.mxu1 }
 0x665   :  { %v1049_v16 = vadd.f32 %v1730_v3, %v1039_v12  ;;  %v1015_v17 = vadd.f32 %v1004_v13, %v956_v38  ;;  %v1712_v13 = vld [vmem:[#allocation5 + $0xe0] sm:$0xff] }
 0x666   :  { %1351 = vmatpush.bf16.msra.mxu3 %v1712_v13 }
 0x667   :  { %v1054_v5 = vpack.c.bf16 %v1049_v16, %v1049_v16  ;;  %v1025_v18 = vadd.f32 %v2100_v51, %v1015_v17 }
 0x669   :  { %v1074_v22 = vunpack.c.l.b16 %v1054_v5  ;;  %v1030_v23 = vmax.f32 %v1025_v18, 0.0 }
 0x66b   :  { %v1078_v25 = vpack.c.b16 %v1074_v22, %v1073_v20  ;;  %v1040_v28 = vmul.f32 %v1729_v60, %v1030_v23 }
 0x66c   :  { %v1006_v26 = vpop.f32.mrf.mxu1 }
 0x66d   :  { %v1016_v29 = vadd.f32 %v1006_v26, %v957_v24  ;;  %1636 = vmatmul.msk.bf16.vlgmr.msra.gmra.mxu0 %vm94_vm0, %v1078_v25  ;;  %v1050_v33 = vadd.f32 %v1730_v3, %v1040_v28  ;;  %v1084_v44 = vshll.u32 %v1078_v25, 16  ;;  %v1082_v49 = vshrl.u32 %v1078_v25, 16 }
 0x66e   :  { %v1194_v54 = vrot.slane %v1078_v25, 1  ;;  %v1318_v55 = vrot.slane %v1078_v25, 2 }
 0x66f   :  { %v1026_v30 = vadd.f32 %v2100_v51, %v1016_v29  ;;  %v1055_v41 = vpack.c.bf16 %v1050_v33, %v1050_v33  ;;  %v1086_v50 = vrot.slane %v1084_v44, 1  ;;  %v1253_v21 = vrot.slane %v1082_v49, 1 }
 0x670   :  { %v1254_v61 = vrot.slane %v1084_v44, 2 }
 0x671   :  { %v1031_v35 = vmax.f32 %v1026_v30, 0.0  ;;  %v1075_v45 = vunpack.c.l.b16 %v1055_v41  ;;  %v1087_v59 = vor.u32 %v1086_v50, %v1082_v49 }
 0x672   :  { %v1255_v8 = vor.u32 %v1254_v61, %v1253_v21  ;;  %v1732_v21 = vld [vmem:[%s2165_s8 + $0x2] ss:$0 sm:$0xff] }
 0x673   :  { %v1041_v36 = vmul.f32 %v1729_v60, %v1031_v35 }
 0x674   :  { %v1009_v37 = vpop.f32.mrf.mxu1 }
 0x675   :  { %v1051_v42 = vadd.f32 %v1730_v3, %v1041_v36  ;;  %v1017_v43 = vadd.f32 %v1009_v37, %v958_v7 }
 0x677   :  { %v1056_v34 = vpack.c.bf16 %v1051_v42, %v1051_v42  ;;  %v1027_v40 = vadd.f32 %v2100_v51, %v1017_v43 }
 0x679   :  { %v1076_v46 = vunpack.c.l.b16 %v1056_v34  ;;  %v1032_v47 = vmax.f32 %v1027_v40, 0.0 }
 0x67b   :  { %v1079_v52 = vpack.c.b16 %v1076_v46, %v1075_v45  ;;  %v1042_v53 = vmul.f32 %v1729_v60, %v1032_v47 }
 0x67c   :  { %v1011_v39 = vpop.f32.mrf.mxu1 }
 0x67d   :  { %v1052_v48 = vadd.f32 %v1730_v3, %v1042_v53  ;;  %1637 = vmatmul.msk.bf16.gmra.mxu0 %vm94_vm0, %v1079_v52  ;;  %v1195_v56 = vrot.slane %v1079_v52, 1  ;;  %v1089_v57 = vshll.u32 %v1079_v52, 16  ;;  %v1093_v58 = vshrl.u32 %v1079_v52, 16 }
 0x67e   :  { %v1319_v51 = vrot.slane %v1079_v52, 2 }
 0x67f   :  { %v1057_v62 = vpack.c.bf16 %v1052_v48, %v1052_v48  ;;  %v1196_v63 = vsel %vm467_vm9, %v1194_v54, %v1195_v56  ;;  %v1091_v0 = vrot.slane %v1089_v57, 1  ;;  %v1256_v2 = vrot.slane %v1093_v58, 1 }
 0x680   :  { %1647 = vmatmul.msk.bf16.vlgmr.msra.gmra.mxu2 %vm94_vm0, %v1196_v63  ;;  %v1257_v60 = vrot.slane %v1089_v57, 2  ;;  %v1320_v4 = vsel %vm597_vm11, %v1318_v55, %v1319_v51 }
 0x681   :  { %v1077_v3 = vunpack.c.l.b16 %v1057_v62  ;;  %v1092_v6 = vsel %vm351_vm10, %v1087_v59, %v1091_v0  ;;  %v1095_v15 = vor.u32 %v1093_v58, %v1091_v0 }
 0x682   :  { %1625 = vmatmul.msk.bf16.vlgmr.msrb.gmra.mxu3 %vm94_vm0, %v1092_v6  ;;  %v1258_v9 = vor.u32 %v1257_v60, %v1256_v2 }
 0x683   :  { %v1080_v31 = vpack.c.b16 %v1077_v3, %v1077_v3 }
 0x684   :  { %v1259_v10 = vsel %vm529_vm12, %v1255_v8, %v1258_v9 }
 0x685   :  { %1658 = vmatmul.msk.bf16.vlgmr.msra.gmra.mxu1 %vm94_vm0, %v1259_v10  ;;  %v1197_v11 = vrot.slane %v1080_v31, 1  ;;  %v1097_v38 = vshll.u32 %v1080_v31, 16  ;;  %v1101_v12 = vshrl.u32 %v1080_v31, 16  ;;  %v1321_v14 = vrot.slane %v1080_v31, 2 }
 0x687   :  { %v1198_v16 = vsel %vm467_vm9, %v1195_v56, %v1197_v11  ;;  %v1099_v17 = vrot.slane %v1097_v38, 1  ;;  %v1260_v5 = vrot.slane %v1101_v12, 1  ;;  %v1261_v18 = vrot.slane %v1097_v38, 2  ;;  %v1731_v56 = vld [vmem:[%s2164_s7 + $0x2] ss:$0 sm:$0xff]  ;;  %s1849_s7 = smov [#allocation8]  }
 0x688   :  { %v1322_v19 = vsel %vm597_vm11, %v1319_v51, %v1321_v14  ;;  %v1733_v51 = vld [vmem:[%s2166_s9 + $0x2] ss:$0 sm:$0xff]  ;;  %s1438_s8 = sshll.u32 %s1849_s7, 4  ;;  %s1439_s8 = int_to_ptr.vmem [resolvable:$true] %s1438_s8 }
 0x689   :  { %v1100_v20 = vsel %vm351_vm10, %v1095_v15, %v1099_v17  ;;  %v1262_v22 = vor.u32 %v1261_v18, %v1260_v5  ;;  %v1103_v24 = vor.u32 %v1101_v12, %v1099_v17 }
 0x68b   :  { %v1263_v23 = vsel %vm529_vm12, %v1258_v9, %v1262_v22 }
 0x68d   :  { %1638 = vmatmul.msk.bf16.gmra.mxu0 %vm94_vm0, %v1080_v31 }
 0x690   :  { %1648 = vmatmul.msk.bf16.gmra.mxu2 %vm94_vm0, %v1198_v16 }
 0x692   :  { %1626 = vmatmul.msk.bf16.gmra.mxu3 %vm94_vm0, %v1100_v20 }
 0x695   :  { %1659 = vmatmul.msk.bf16.gmra.mxu1 %vm94_vm0, %v1263_v23 }
 0x6a0   :  { %1649 = vmatmul.msk.bf16.gmra.mxu2 %vm94_vm0, %v1197_v11 }
 0x6a2   :  { %1627 = vmatmul.msk.bf16.gmra.mxu3 %vm94_vm0, %v1103_v24 }
 0x6a5   :  { %1660 = vmatmul.msk.bf16.gmra.mxu1 %vm94_vm0, %v1262_v22 }
 0x6b2   :  { %1669 = vmatmul.msk.bf16.vlgmr.msra.gmra.mxu3 %vm94_vm0, %v1320_v4 }
 0x6c2   :  { %1670 = vmatmul.msk.bf16.gmra.mxu3 %vm94_vm0, %v1322_v19 }
 0x6d2   :  { %1671 = vmatmul.msk.bf16.gmra.mxu3 %vm94_vm0, %v1321_v14 }
 0x6ea   :  { %v1175_v25 = vpop.f32.mrf.mxu0 }
 0x6f2   :  { %v1177_v26 = vpop.f32.mrf.mxu0 }
 0x6fa   :  { %v1180_v27 = vpop.f32.mrf.mxu0 }
 0x702   :  { %v1294_v28 = vpop.f32.mrf.mxu1  ;;  %v1182_v29 = vpop.f32.mrf.mxu0 }
 0x703   :  { %v1229_v1 = vpop.f32.mrf.mxu2 }
 0x705   :  { %v1134_v30 = vpop.f32.mrf.mxu3 }
 0x706   :  { %v1176_v39 = vadd.f32 %v1175_v25, %v1134_v30 }
 0x708   :  { %v1243_v55 = vadd.f32 %v1229_v1, %v1176_v39 }
 0x70a   :  { %v1296_v32 = vpop.f32.mrf.mxu1  ;;  %v1185_v33 = vpop.f32.mrf.mxu0  ;;  %v1308_v48 = vadd.f32 %v1294_v28, %v1243_v55 }
 0x70b   :  { %v1231_v35 = vpop.f32.mrf.mxu2 }
 0x70d   :  { %v1136_v7 = vpop.f32.mrf.mxu3 }
 0x70e   :  { %v1178_v36 = vadd.f32 %v1177_v26, %v1136_v7 }
 0x710   :  { %v1244_v37 = vadd.f32 %v1231_v35, %v1178_v36 }
 0x712   :  { %v1299_v41 = vpop.f32.mrf.mxu1  ;;  %v1187_v42 = vpop.f32.mrf.mxu0  ;;  %v1309_v43 = vadd.f32 %v1296_v32, %v1244_v37 }
 0x713   :  { %v1234_v44 = vpop.f32.mrf.mxu2 }
 0x715   :  { %v1139_v34 = vpop.f32.mrf.mxu3 }
 0x716   :  { %v1181_v62 = vadd.f32 %v1180_v27, %v1139_v34 }
 0x718   :  { %v1245_v60 = vadd.f32 %v1234_v44, %v1181_v62 }
 0x71a   :  { %v1301_v40 = vpop.f32.mrf.mxu1  ;;  %v1310_v3 = vadd.f32 %v1299_v41, %v1245_v60 }
 0x71b   :  { %v1236_v45 = vpop.f32.mrf.mxu2 }
 0x71d   :  { %v1141_v46 = vpop.f32.mrf.mxu3 }
 0x71e   :  { %v1183_v4 = vadd.f32 %v1182_v29, %v1141_v46 }
 0x720   :  { %v1246_v9 = vadd.f32 %v1236_v45, %v1183_v4 }
 0x722   :  { %v1304_v47 = vpop.f32.mrf.mxu1  ;;  %v1311_v12 = vadd.f32 %v1301_v40, %v1246_v9 }
 0x723   :  { %v1239_v49 = vpop.f32.mrf.mxu2 }
 0x725   :  { %v1144_v50 = vpop.f32.mrf.mxu3 }
 0x726   :  { %v1186_v11 = vadd.f32 %v1185_v33, %v1144_v50 }
 0x728   :  { %v1247_v16 = vadd.f32 %v1239_v49, %v1186_v11 }
 0x72a   :  { %v1306_v52 = vpop.f32.mrf.mxu1  ;;  %v1312_v23 = vadd.f32 %v1304_v47, %v1247_v16 }
 0x72b   :  { %v1241_v53 = vpop.f32.mrf.mxu2 }
 0x72d   :  { %v1146_v54 = vpop.f32.mrf.mxu3 }
 0x735   :  { %v1353_v57 = vpop.f32.mrf.mxu3 }
 0x736   :  { %v1367_v58 = vadd.f32 %v1353_v57, %v1308_v48 }
 0x738   :  { %v1377_v59 = vadd.f32 %v1731_v56, %v1367_v58 }
 0x73a   :  { %v1382_v61 = vmax.f32 %v1377_v59, 0.0 }
 0x73c   :  { %v1392_v63 = vmul.f32 %v1732_v21, %v1382_v61 }
 0x73d   :  { %v1355_v0 = vpop.f32.mrf.mxu3 }
 0x73e   :  { %v1402_v2 = vadd.f32 %v1733_v51, %v1392_v63  ;;  %v1368_v10 = vadd.f32 %v1355_v0, %v1309_v43 }
 0x740   :  { %1419 = vst.msk [vmem:[#allocation8] sm:$0xff] %vm94_vm0, %v1402_v2  ;;  %v1378_v13 = vadd.f32 %v1731_v56, %v1368_v10 }
 0x742   :  { %v1383_v18 = vmax.f32 %v1378_v13, 0.0 }
 0x744   :  { %v1393_v24 = vmul.f32 %v1732_v21, %v1383_v18 }
 0x745   :  { %v1358_v6 = vpop.f32.mrf.mxu3 }
 0x746   :  { %v1369_v8 = vadd.f32 %v1358_v6, %v1310_v3  ;;  %v1403_v30 = vadd.f32 %v1733_v51, %v1393_v24 }
 0x748   :  { %v1379_v31 = vadd.f32 %v1731_v56, %v1369_v8 }
 0x74a   :  { %v1384_v38 = vmax.f32 %v1379_v31, 0.0 }
 0x74c   :  { %v1394_v17 = vmul.f32 %v1732_v21, %v1384_v38 }
 0x74d   :  { %v1360_v14 = vpop.f32.mrf.mxu3 }
 0x74e   :  { %v1370_v15 = vadd.f32 %v1360_v14, %v1311_v12  ;;  %v1404_v20 = vadd.f32 %v1733_v51, %v1394_v17 }
 0x750   :  { %v1380_v5 = vadd.f32 %v1731_v56, %v1370_v15  ;;  %v1410_v28 = vrot.slane %v1404_v20, 4 }
 0x752   :  { %v1385_v19 = vmax.f32 %v1380_v5, 0.0 }
 0x754   :  { %v1395_v22 = vmul.f32 %v1732_v21, %v1385_v19 }
 0x755   :  { %v1363_v25 = vpop.f32.mrf.mxu3 }
 0x756   :  { %v1405_v26 = vadd.f32 %v1733_v51, %v1395_v22  ;;  %v1371_v27 = vadd.f32 %v1363_v25, %v1312_v23 }
 0x758   :  { %v1411_v29 = vrot.slane %v1405_v26, 4  ;;  %v1381_v1 = vadd.f32 %v1731_v56, %v1371_v27 }
 0x75a   :  { %v1412_v32 = vsel %vm117_vm1, %v1410_v28, %v1411_v29  ;;  %v1386_v33 = vmax.f32 %v1381_v1, 0.0 }
 0x75b   :  { %v1418_v35 = vsel %vm1417_vm2, %v1403_v30, %v1412_v32 }
 0x75c   :  { %1420 = vst.msk [vmem:[#allocation8 + $0x8] sm:$0xff] %vm94_vm0, %v1418_v35  ;;  %v1396_v7 = vmul.f32 %v1732_v21, %v1386_v33 }
 0x75d   :  { %v1365_v36 = vpop.f32.mrf.mxu3 }
 0x75e   :  { %v1406_v37 = vadd.f32 %v1733_v51, %v1396_v7 }
 0x760   :  { %v1413_v41 = vrot.slane %v1406_v37, 4 }
 0x762   :  { %v1414_v42 = vsel %vm117_vm1, %v1411_v29, %v1413_v41 }
 0x763   :  { %1422 = vst.msk [vmem:[#allocation8 + $0x10] sm:$0x3f] %vm1421_vm3, %v1414_v42 }
 0x764   :  { %1446 = dma.vmem_to_hbm [thread:$0]  %s1439_s8, 384, %s1441_s22, [#allocation9], %s1850_s5, %s1850_s5, %s1851_s23  }
 0x765   :  { %1840 = dma.done.wait [#allocation4], 128  }
 0x766   :  { %1841 = vsyncadd [#allocation4], 4294967168 }
 0x767   :  { %1842 = dma.done.wait [#allocation9], 384  }
 0x768   :  { %1843 = vsyncadd [#allocation9], 4294966912 }
 0x769   :  { %1455 = vsyncpa [#allocation3], 1 }
 0x76a   :  { %1456 = vsyncpa [#allocation6], 1 }
 0x76b   :  { %1457 = vsyncpa [#allocation4], 1 }
 0x76c   :  { %1458 = vsyncpa [#allocation9], 1 }

</bundles_post_ra>
